<compile_context>
chip_gen: v7x
topology: tpu7x:2x2x1
jax: 0.10.0
libtpu: 0.0.40
codegen_flags: <defaults>
</compile_context>

<pallas_src>
import jax
import jax.numpy as jnp
from jax.experimental import pallas as pl
from jax.experimental.pallas import tpu as pltpu

EPS = 1e-5


def _bn_train(x, gamma, beta):
    """BatchNorm1d, training mode, single-pass statistics (f32)."""
    inv_n = 1.0 / x.shape[0]
    mu = jnp.sum(x, axis=0, keepdims=True) * inv_n
    ex2 = jnp.sum(x * x, axis=0, keepdims=True) * inv_n
    var = jnp.maximum(ex2 - mu * mu, 0.0)  # biased variance, clamp tiny negatives
    return (x - mu) * jax.lax.rsqrt(var + EPS) * gamma + beta


def _mm(x_f32, w_bf16, b_f32):
    """bf16 MXU matmul with f32 accumulation; bias add in f32."""
    return jnp.dot(x_f32.astype(jnp.bfloat16), w_bf16,
                   preferred_element_type=jnp.float32) + b_f32


def hbc_kernel(
    state_ref,
    w1_ref, b1_ref,
    w2_ref, b2_ref, g2_ref, be2_ref,
    w3_ref, b3_ref, g3_ref, be3_ref,
    wp1_ref, bp1_ref, gp_ref, bep_ref,
    wh_ref, bh_ref,          # fused head: blockdiag(wp2, wg) -> (512, 4), bias (1, 4)
    out_ref,
):
    x = state_ref[...]

    # --- self.net ---
    h = jnp.maximum(_mm(x, w1_ref[...], b1_ref[...]), 0.0)
    h = jnp.maximum(
        _bn_train(_mm(h, w2_ref[...], b2_ref[...]), g2_ref[...], be2_ref[...]), 0.0)
    common = jnp.maximum(
        _bn_train(_mm(h, w3_ref[...], b3_ref[...]), g3_ref[...], be3_ref[...]), 0.0)

    # --- self.net_pos (first layer) ---
    p = jnp.maximum(
        _bn_train(_mm(common, wp1_ref[...], bp1_ref[...]), gp_ref[...], bep_ref[...]),
        0.0)

    # --- fused heads ---
    # [pos | grip] = tanh([p | common] @ blockdiag(wp2, wg) + [bp2 | bg])
    head_in = jnp.concatenate([p, common], axis=1)            # (B, 512), f32
    out = jnp.tanh(_mm(head_in, wh_ref[...], bh_ref[...]))    # (B, 4),  f32
    out_ref[...] = out.astype(out_ref.dtype)                  # single full store


def prepare_kernel_params(params):
    """Cast weights to bf16 and fuse the two head projections into one matmul."""
    (w1, b1, w2, b2, g2, be2, w3, b3, g3, be3,
     wp1, bp1, gp, bep, wp2, bp2, wg, bg) = params
    wh = jnp.zeros((512, 4), jnp.float32)
    wh = wh.at[:256, 0:3].set(wp2)
    wh = wh.at[256:, 3:4].set(wg)
    bh = jnp.concatenate([bp2, bg], axis=1)
    bf = lambda w: w.astype(jnp.bfloat16)
    return (bf(w1), b1,
            bf(w2), b2, g2, be2,
            bf(w3), b3, g3, be3,
            bf(wp1), bp1, gp, bep,
            bf(wh), bh)


def hbc_forward(state, kernel_params):
    B = state.shape[0]
    n_in = 1 + len(kernel_params)
    vmem = pl.BlockSpec(memory_space=pltpu.MemorySpace.VMEM)
    return pl.pallas_call(
        hbc_kernel,
        out_shape=jax.ShapeDtypeStruct((B, 4), jnp.float32),
        in_specs=[vmem] * n_in,
        out_specs=vmem,
    )(state, *kernel_params)


def init_params(key, all_dim):
    """Deterministic synthetic parameter init (shapes match the nn.Module), f32."""
    def lin(k, fan_in, fan_out):
        kw, kb = jax.random.split(k)
        scale = 1.0 / jnp.sqrt(fan_in)
        w = jax.random.uniform(kw, (fan_in, fan_out), jnp.float32, -scale, scale)
        b = jax.random.uniform(kb, (1, fan_out), jnp.float32, -scale, scale)
        return w, b

    def bn(n):
        return jnp.ones((1, n), jnp.float32), jnp.zeros((1, n), jnp.float32)

    ks = jax.random.split(key, 7)
    w1, b1 = lin(ks[0], all_dim, 512)
    w2, b2 = lin(ks[1], 512, 512)
    g2, be2 = bn(512)
    w3, b3 = lin(ks[2], 512, 256)
    g3, be3 = bn(256)
    wp1, bp1 = lin(ks[3], 256, 256)
    gp, bep = bn(256)
    wp2, bp2 = lin(ks[4], 256, 3)
    wg, bg = lin(ks[5], 256, 1)
    return (w1, b1, w2, b2, g2, be2, w3, b3, g3, be3,
            wp1, bp1, gp, bep, wp2, bp2, wg, bg)


def reference_forward(state, params):
    """Pure-JAX reference with the same bf16-operand / f32-accumulate precision."""
    (w1, b1, w2, b2, g2, be2, w3, b3, g3, be3,
     wp1, bp1, gp, bep, wp2, bp2, wg, bg) = params
    bf = lambda w: w.astype(jnp.bfloat16)
    h = jnp.maximum(_mm(state, bf(w1), b1), 0.0)
    h = jnp.maximum(_bn_train(_mm(h, bf(w2), b2), g2, be2), 0.0)
    common = jnp.maximum(_bn_train(_mm(h, bf(w3), b3), g3, be3), 0.0)
    p = jnp.maximum(_bn_train(_mm(common, bf(wp1), bp1), gp, bep), 0.0)
    pos = jnp.tanh(_mm(p, bf(wp2), bp2))
    grip = jnp.tanh(_mm(common, bf(wg), bg))
    return jnp.concatenate([pos, grip], axis=1)


if __name__ == "__main__":
    B, ALL_DIM = 8, 32
    key = jax.random.PRNGKey(0)
    k_state, k_params = jax.random.split(key)

    state = jax.random.normal(k_state, (B, ALL_DIM), jnp.float32)
    params = init_params(k_params, ALL_DIM)
    kparams = prepare_kernel_params(params)

    out = hbc_forward(state, kparams)
    out = jax.block_until_ready(out)

    ref = reference_forward(state, params)
    assert out.shape == (B, 4), out.shape
    assert jnp.allclose(out, ref, atol=2e-3, rtol=2e-3), float(
        jnp.max(jnp.abs(out - ref)))

    print("KERNEL_OK")
</pallas_src>

<mosaic_0001>
module attributes {stable_mosaic.version = 11 : i64} {
  func.func @hbc_kernel(%arg0: memref<8x32xf32, #tpu.memory_space<vmem>>, %arg1: memref<32x512xbf16, #tpu.memory_space<vmem>>, %arg2: memref<1x512xf32, #tpu.memory_space<vmem>>, %arg3: memref<512x512xbf16, #tpu.memory_space<vmem>>, %arg4: memref<1x512xf32, #tpu.memory_space<vmem>>, %arg5: memref<1x512xf32, #tpu.memory_space<vmem>>, %arg6: memref<1x512xf32, #tpu.memory_space<vmem>>, %arg7: memref<512x256xbf16, #tpu.memory_space<vmem>>, %arg8: memref<1x256xf32, #tpu.memory_space<vmem>>, %arg9: memref<1x256xf32, #tpu.memory_space<vmem>>, %arg10: memref<1x256xf32, #tpu.memory_space<vmem>>, %arg11: memref<256x256xbf16, #tpu.memory_space<vmem>>, %arg12: memref<1x256xf32, #tpu.memory_space<vmem>>, %arg13: memref<1x256xf32, #tpu.memory_space<vmem>>, %arg14: memref<1x256xf32, #tpu.memory_space<vmem>>, %arg15: memref<512x4xbf16, #tpu.memory_space<vmem>>, %arg16: memref<1x4xf32, #tpu.memory_space<vmem>>, %arg17: memref<8x4xf32, #tpu.memory_space<vmem>>) attributes {dimension_semantics = [], scalar_prefetch = 0 : i64, scratch_operands = 0 : i64, tpu.core_type = #tpu.core_type<tc>} {
    %c0 = arith.constant 0 : index
    %c0_0 = arith.constant 0 : index
    %0 = vector.load %arg0[%c0, %c0_0] : memref<8x32xf32, #tpu.memory_space<vmem>>, vector<8x32xf32>
    %c0_1 = arith.constant 0 : index
    %c0_2 = arith.constant 0 : index
    %1 = vector.load %arg1[%c0_1, %c0_2] : memref<32x512xbf16, #tpu.memory_space<vmem>>, vector<32x512xbf16>
    %c0_3 = arith.constant 0 : index
    %c0_4 = arith.constant 0 : index
    %2 = vector.load %arg2[%c0_3, %c0_4] : memref<1x512xf32, #tpu.memory_space<vmem>>, vector<1x512xf32>
    %3 = arith.truncf %0 : vector<8x32xf32> to vector<8x32xbf16>
    %cst = arith.constant dense<0.000000e+00> : vector<8x512xf32>
    %4 = tpu.matmul %3, %1, %cst {dimension_numbers = #tpu.dot_dimension_numbers<[1], [0], [0], [1], [0, 0, 1, 1], [], []>} : vector<8x32xbf16>, vector<32x512xbf16>, vector<8x512xf32> -> vector<8x512xf32>
    %5 = vector.broadcast %2 : vector<1x512xf32> to vector<8x512xf32>
    %6 = arith.addf %4, %5 : vector<8x512xf32>
    %cst_5 = arith.constant 0.000000e+00 : f32
    %7 = vector.broadcast %cst_5 : f32 to vector<8x512xf32>
    %8 = arith.maximumf %6, %7 : vector<8x512xf32>
    %c0_6 = arith.constant 0 : index
    %c0_7 = arith.constant 0 : index
    %9 = vector.load %arg3[%c0_6, %c0_7] : memref<512x512xbf16, #tpu.memory_space<vmem>>, vector<512x512xbf16>
    %c0_8 = arith.constant 0 : index
    %c0_9 = arith.constant 0 : index
    %10 = vector.load %arg4[%c0_8, %c0_9] : memref<1x512xf32, #tpu.memory_space<vmem>>, vector<1x512xf32>
    %11 = arith.truncf %8 : vector<8x512xf32> to vector<8x512xbf16>
    %cst_10 = arith.constant dense<0.000000e+00> : vector<8x512xf32>
    %12 = tpu.matmul %11, %9, %cst_10 {dimension_numbers = #tpu.dot_dimension_numbers<[1], [0], [0], [1], [0, 0, 1, 1], [], []>} : vector<8x512xbf16>, vector<512x512xbf16>, vector<8x512xf32> -> vector<8x512xf32>
    %13 = vector.broadcast %10 : vector<1x512xf32> to vector<8x512xf32>
    %14 = arith.addf %12, %13 : vector<8x512xf32>
    %c0_11 = arith.constant 0 : index
    %c0_12 = arith.constant 0 : index
    %15 = vector.load %arg5[%c0_11, %c0_12] : memref<1x512xf32, #tpu.memory_space<vmem>>, vector<1x512xf32>
    %c0_13 = arith.constant 0 : index
    %c0_14 = arith.constant 0 : index
    %16 = vector.load %arg6[%c0_13, %c0_14] : memref<1x512xf32, #tpu.memory_space<vmem>>, vector<1x512xf32>
    %cst_15 = arith.constant dense<0.000000e+00> : vector<512xf32>
    %17 = vector.multi_reduction <add>, %14, %cst_15 [0] : vector<8x512xf32> to vector<512xf32>
    %18 = vector.shape_cast %17 : vector<512xf32> to vector<1x512xf32>
    %cst_16 = arith.constant 1.250000e-01 : f32
    %19 = vector.broadcast %cst_16 : f32 to vector<1x512xf32>
    %20 = arith.mulf %18, %19 : vector<1x512xf32>
    %21 = arith.mulf %14, %14 : vector<8x512xf32>
    %cst_17 = arith.constant dense<0.000000e+00> : vector<512xf32>
    %22 = vector.multi_reduction <add>, %21, %cst_17 [0] : vector<8x512xf32> to vector<512xf32>
    %23 = vector.shape_cast %22 : vector<512xf32> to vector<1x512xf32>
    %cst_18 = arith.constant 1.250000e-01 : f32
    %24 = vector.broadcast %cst_18 : f32 to vector<1x512xf32>
    %25 = arith.mulf %23, %24 : vector<1x512xf32>
    %26 = arith.mulf %20, %20 : vector<1x512xf32>
    %27 = arith.subf %25, %26 : vector<1x512xf32>
    %cst_19 = arith.constant 0.000000e+00 : f32
    %28 = vector.broadcast %cst_19 : f32 to vector<1x512xf32>
    %29 = arith.maximumf %27, %28 : vector<1x512xf32>
    %30 = vector.broadcast %20 : vector<1x512xf32> to vector<8x512xf32>
    %31 = arith.subf %14, %30 : vector<8x512xf32>
    %cst_20 = arith.constant 9.99999974E-6 : f32
    %32 = vector.broadcast %cst_20 : f32 to vector<1x512xf32>
    %33 = arith.addf %29, %32 : vector<1x512xf32>
    %34 = math.rsqrt %33 : vector<1x512xf32>
    %35 = vector.broadcast %34 : vector<1x512xf32> to vector<8x512xf32>
    %36 = arith.mulf %31, %35 : vector<8x512xf32>
    %37 = vector.broadcast %15 : vector<1x512xf32> to vector<8x512xf32>
    %38 = arith.mulf %36, %37 : vector<8x512xf32>
    %39 = vector.broadcast %16 : vector<1x512xf32> to vector<8x512xf32>
    %40 = arith.addf %38, %39 : vector<8x512xf32>
    %cst_21 = arith.constant 0.000000e+00 : f32
    %41 = vector.broadcast %cst_21 : f32 to vector<8x512xf32>
    %42 = arith.maximumf %40, %41 : vector<8x512xf32>
    %c0_22 = arith.constant 0 : index
    %c0_23 = arith.constant 0 : index
    %43 = vector.load %arg7[%c0_22, %c0_23] : memref<512x256xbf16, #tpu.memory_space<vmem>>, vector<512x256xbf16>
    %c0_24 = arith.constant 0 : index
    %c0_25 = arith.constant 0 : index
    %44 = vector.load %arg8[%c0_24, %c0_25] : memref<1x256xf32, #tpu.memory_space<vmem>>, vector<1x256xf32>
    %45 = arith.truncf %42 : vector<8x512xf32> to vector<8x512xbf16>
    %cst_26 = arith.constant dense<0.000000e+00> : vector<8x256xf32>
    %46 = tpu.matmul %45, %43, %cst_26 {dimension_numbers = #tpu.dot_dimension_numbers<[1], [0], [0], [1], [0, 0, 1, 1], [], []>} : vector<8x512xbf16>, vector<512x256xbf16>, vector<8x256xf32> -> vector<8x256xf32>
    %47 = vector.broadcast %44 : vector<1x256xf32> to vector<8x256xf32>
    %48 = arith.addf %46, %47 : vector<8x256xf32>
    %c0_27 = arith.constant 0 : index
    %c0_28 = arith.constant 0 : index
    %49 = vector.load %arg9[%c0_27, %c0_28] : memref<1x256xf32, #tpu.memory_space<vmem>>, vector<1x256xf32>
    %c0_29 = arith.constant 0 : index
    %c0_30 = arith.constant 0 : index
    %50 = vector.load %arg10[%c0_29, %c0_30] : memref<1x256xf32, #tpu.memory_space<vmem>>, vector<1x256xf32>
    %cst_31 = arith.constant dense<0.000000e+00> : vector<256xf32>
    %51 = vector.multi_reduction <add>, %48, %cst_31 [0] : vector<8x256xf32> to vector<256xf32>
    %52 = vector.shape_cast %51 : vector<256xf32> to vector<1x256xf32>
    %cst_32 = arith.constant 1.250000e-01 : f32
    %53 = vector.broadcast %cst_32 : f32 to vector<1x256xf32>
    %54 = arith.mulf %52, %53 : vector<1x256xf32>
    %55 = arith.mulf %48, %48 : vector<8x256xf32>
    %cst_33 = arith.constant dense<0.000000e+00> : vector<256xf32>
    %56 = vector.multi_reduction <add>, %55, %cst_33 [0] : vector<8x256xf32> to vector<256xf32>
    %57 = vector.shape_cast %56 : vector<256xf32> to vector<1x256xf32>
    %cst_34 = arith.constant 1.250000e-01 : f32
    %58 = vector.broadcast %cst_34 : f32 to vector<1x256xf32>
    %59 = arith.mulf %57, %58 : vector<1x256xf32>
    %60 = arith.mulf %54, %54 : vector<1x256xf32>
    %61 = arith.subf %59, %60 : vector<1x256xf32>
    %cst_35 = arith.constant 0.000000e+00 : f32
    %62 = vector.broadcast %cst_35 : f32 to vector<1x256xf32>
    %63 = arith.maximumf %61, %62 : vector<1x256xf32>
    %64 = vector.broadcast %54 : vector<1x256xf32> to vector<8x256xf32>
    %65 = arith.subf %48, %64 : vector<8x256xf32>
    %cst_36 = arith.constant 9.99999974E-6 : f32
    %66 = vector.broadcast %cst_36 : f32 to vector<1x256xf32>
    %67 = arith.addf %63, %66 : vector<1x256xf32>
    %68 = math.rsqrt %67 : vector<1x256xf32>
    %69 = vector.broadcast %68 : vector<1x256xf32> to vector<8x256xf32>
    %70 = arith.mulf %65, %69 : vector<8x256xf32>
    %71 = vector.broadcast %49 : vector<1x256xf32> to vector<8x256xf32>
    %72 = arith.mulf %70, %71 : vector<8x256xf32>
    %73 = vector.broadcast %50 : vector<1x256xf32> to vector<8x256xf32>
    %74 = arith.addf %72, %73 : vector<8x256xf32>
    %cst_37 = arith.constant 0.000000e+00 : f32
    %75 = vector.broadcast %cst_37 : f32 to vector<8x256xf32>
    %76 = arith.maximumf %74, %75 : vector<8x256xf32>
    %c0_38 = arith.constant 0 : index
    %c0_39 = arith.constant 0 : index
    %77 = vector.load %arg11[%c0_38, %c0_39] : memref<256x256xbf16, #tpu.memory_space<vmem>>, vector<256x256xbf16>
    %c0_40 = arith.constant 0 : index
    %c0_41 = arith.constant 0 : index
    %78 = vector.load %arg12[%c0_40, %c0_41] : memref<1x256xf32, #tpu.memory_space<vmem>>, vector<1x256xf32>
    %79 = arith.truncf %76 : vector<8x256xf32> to vector<8x256xbf16>
    %cst_42 = arith.constant dense<0.000000e+00> : vector<8x256xf32>
    %80 = tpu.matmul %79, %77, %cst_42 {dimension_numbers = #tpu.dot_dimension_numbers<[1], [0], [0], [1], [0, 0, 1, 1], [], []>} : vector<8x256xbf16>, vector<256x256xbf16>, vector<8x256xf32> -> vector<8x256xf32>
    %81 = vector.broadcast %78 : vector<1x256xf32> to vector<8x256xf32>
    %82 = arith.addf %80, %81 : vector<8x256xf32>
    %c0_43 = arith.constant 0 : index
    %c0_44 = arith.constant 0 : index
    %83 = vector.load %arg13[%c0_43, %c0_44] : memref<1x256xf32, #tpu.memory_space<vmem>>, vector<1x256xf32>
    %c0_45 = arith.constant 0 : index
    %c0_46 = arith.constant 0 : index
    %84 = vector.load %arg14[%c0_45, %c0_46] : memref<1x256xf32, #tpu.memory_space<vmem>>, vector<1x256xf32>
    %cst_47 = arith.constant dense<0.000000e+00> : vector<256xf32>
    %85 = vector.multi_reduction <add>, %82, %cst_47 [0] : vector<8x256xf32> to vector<256xf32>
    %86 = vector.shape_cast %85 : vector<256xf32> to vector<1x256xf32>
    %cst_48 = arith.constant 1.250000e-01 : f32
    %87 = vector.broadcast %cst_48 : f32 to vector<1x256xf32>
    %88 = arith.mulf %86, %87 : vector<1x256xf32>
    %89 = arith.mulf %82, %82 : vector<8x256xf32>
    %cst_49 = arith.constant dense<0.000000e+00> : vector<256xf32>
    %90 = vector.multi_reduction <add>, %89, %cst_49 [0] : vector<8x256xf32> to vector<256xf32>
    %91 = vector.shape_cast %90 : vector<256xf32> to vector<1x256xf32>
    %cst_50 = arith.constant 1.250000e-01 : f32
    %92 = vector.broadcast %cst_50 : f32 to vector<1x256xf32>
    %93 = arith.mulf %91, %92 : vector<1x256xf32>
    %94 = arith.mulf %88, %88 : vector<1x256xf32>
    %95 = arith.subf %93, %94 : vector<1x256xf32>
    %cst_51 = arith.constant 0.000000e+00 : f32
    %96 = vector.broadcast %cst_51 : f32 to vector<1x256xf32>
    %97 = arith.maximumf %95, %96 : vector<1x256xf32>
    %98 = vector.broadcast %88 : vector<1x256xf32> to vector<8x256xf32>
    %99 = arith.subf %82, %98 : vector<8x256xf32>
    %cst_52 = arith.constant 9.99999974E-6 : f32
    %100 = vector.broadcast %cst_52 : f32 to vector<1x256xf32>
    %101 = arith.addf %97, %100 : vector<1x256xf32>
    %102 = math.rsqrt %101 : vector<1x256xf32>
    %103 = vector.broadcast %102 : vector<1x256xf32> to vector<8x256xf32>
    %104 = arith.mulf %99, %103 : vector<8x256xf32>
    %105 = vector.broadcast %83 : vector<1x256xf32> to vector<8x256xf32>
    %106 = arith.mulf %104, %105 : vector<8x256xf32>
    %107 = vector.broadcast %84 : vector<1x256xf32> to vector<8x256xf32>
    %108 = arith.addf %106, %107 : vector<8x256xf32>
    %cst_53 = arith.constant 0.000000e+00 : f32
    %109 = vector.broadcast %cst_53 : f32 to vector<8x256xf32>
    %110 = arith.maximumf %108, %109 : vector<8x256xf32>
    %111 = tpu.concatenate %110, %76 in 1 : vector<8x256xf32>, vector<8x256xf32> -> vector<8x512xf32>
    %c0_54 = arith.constant 0 : index
    %c0_55 = arith.constant 0 : index
    %112 = vector.load %arg15[%c0_54, %c0_55] : memref<512x4xbf16, #tpu.memory_space<vmem>>, vector<512x4xbf16>
    %c0_56 = arith.constant 0 : index
    %c0_57 = arith.constant 0 : index
    %113 = vector.load %arg16[%c0_56, %c0_57] : memref<1x4xf32, #tpu.memory_space<vmem>>, vector<1x4xf32>
    %114 = arith.truncf %111 : vector<8x512xf32> to vector<8x512xbf16>
    %cst_58 = arith.constant dense<0.000000e+00> : vector<8x4xf32>
    %115 = tpu.matmul %114, %112, %cst_58 {dimension_numbers = #tpu.dot_dimension_numbers<[1], [0], [0], [1], [0, 0, 1, 1], [], []>} : vector<8x512xbf16>, vector<512x4xbf16>, vector<8x4xf32> -> vector<8x4xf32>
    %116 = vector.broadcast %113 : vector<1x4xf32> to vector<8x4xf32>
    %117 = arith.addf %115, %116 : vector<8x4xf32>
    %118 = math.tanh %117 : vector<8x4xf32>
    %c0_59 = arith.constant 0 : index
    %c0_60 = arith.constant 0 : index
    %119 = vector.load %arg17[%c0_59, %c0_60] : memref<8x4xf32, #tpu.memory_space<vmem>>, vector<8x4xf32>
    tpu.vector_store %arg17[%c0_59, %c0_60], %118 {strides = array<i32>} : memref<8x4xf32, #tpu.memory_space<vmem>>, vector<8x4xf32>,
    return
  }
}

</mosaic_0001>

<bundles_post_ra>
// kernel: tpu_custom_call.1
= control target key start
LH: loop header
LB: loop body
LE: loop exit
PB: predicated region body
PF: predicated region fallthrough
CT: control target
= control target key end

     0   :  { %s3860_s0 = inlined_call_operand.vmem [shape: f32[8,32], index: 0, kind: input, shape index: {}]   ;;  %s3861_s1 = inlined_call_operand.hbm [shape: bf16[32,512], index: 1, kind: input, shape index: {}]   ;;  %s3862_s2 = inlined_call_operand.vmem [shape: f32[1,512], index: 2, kind: input, shape index: {}]   ;;  %s3863_s3 = inlined_call_operand.hbm [shape: bf16[512,512], index: 3, kind: input, shape index: {}]   ;;  %s3864_s4 = inlined_call_operand.vmem [shape: f32[1,512], index: 4, kind: input, shape index: {}]   ;;  %s3865_s5 = inlined_call_operand.vmem [shape: f32[1,512], index: 5, kind: input, shape index: {}]   ;;  %s3866_s6 = inlined_call_operand.vmem [shape: f32[1,512], index: 6, kind: input, shape index: {}]   ;;  %s3867_s7 = inlined_call_operand.hbm [shape: bf16[512,256], index: 7, kind: input, shape index: {}]   ;;  %s3868_s8 = inlined_call_operand.vmem [shape: f32[1,256], index: 8, kind: input, shape index: {}]   ;;  %s3869_s9 = inlined_call_operand.vmem [shape: f32[1,256], index: 9, kind: input, shape index: {}]   ;;  %s3870_s10 = inlined_call_operand.vmem [shape: f32[1,256], index: 10, kind: input, shape index: {}]   ;;  %s3871_s11 = inlined_call_operand.vmem [shape: bf16[256,256], index: 11, kind: input, shape index: {}]   ;;  %s3872_s12 = inlined_call_operand.vmem [shape: f32[1,256], index: 12, kind: input, shape index: {}]   ;;  %s3873_s13 = inlined_call_operand.vmem [shape: f32[1,256], index: 13, kind: input, shape index: {}]   ;;  %s3874_s14 = inlined_call_operand.vmem [shape: f32[1,256], index: 14, kind: input, shape index: {}]   ;;  %s3875_s15 = inlined_call_operand.vmem [shape: bf16[512,4], index: 15, kind: input, shape index: {}]   ;;  %s3876_s16 = inlined_call_operand.vmem [shape: f32[1,4], index: 16, kind: input, shape index: {}]   ;;  %s3877_s17 = inlined_call_operand.vmem [shape: f32[8,4], index: 17, kind: output, shape index: {}]  }
   0x1   :  { %3879 = sst [smem:[#allocation9_spill]] %s3860_s0 }
   0x2   :  { %3880 = sst [smem:[#allocation10_spill]] %s3861_s1 }
   0x3   :  { %22 = vsyncpa [#allocation3], 0 }
   0x4   :  { %23 = vsyncpa [#allocation5], 0  ;;  %s3398_s24 = smov [#allocation4]   ;;  %s3399_s26 = smov [#allocation2]  }
   0x5   :  { %s45_s25 = sshll.u32 %s3398_s24, 4  ;;  %s31_s27 = sshll.u32 %s3399_s26, 4  ;;  %s46_s25 = int_to_ptr.vmem [resolvable:$true] %s45_s25  ;;  %s3496_s27 = int_to_ptr.vmem [resolvable:$true] %s31_s27 }
   0x6   :  { %s3328_s0 = scalar_lea.hbm %s3863_s3, 16384 }
   0x7   :  { %p3329_p0 = scmp.ne.s32.totalorder %s3863_s3, %s3328_s0  ;;  %p3332_p1 = scmp.lt.u32.totalorder %s3328_s0, %s3863_s3 }
   0x9   :  { %p3334_p2 = pnand %p3332_p1, %p3329_p0 }
   0xb   :  { %3337 = shalt.err (!%p3334_p2)
}
   0xc   :  { %s3338_s20 = scalar_lea.vmem %s46_s25, 16384  ;;  %p3343_p4 = scmp.lt.s32.totalorder %s46_s25, %s46_s25 }
   0xd   :  { %p3339_p3 = scmp.ne.s32.totalorder %s46_s25, %s3338_s20  ;;  %p3344_p5 = scmp.lt.s32.totalorder %s3338_s20, %s3338_s20 }
   0xf   :  { %p3345_p6 = por %p3344_p5, %p3343_p4 }
  0x11   :  { %p3346_p7 = pnand %p3345_p6, %p3339_p3 }
  0x13   :  { %3349 = shalt.err (!%p3346_p7)
}
  0x14   :  { %s3400_s21 = smov 256   ;;  %s3401_s22 = smov 16  }
  0x15   :  { %51 = dma.hbm_to_vmem [thread:$0]  %s3863_s3, 16384, %s46_s25, [#allocation5], %s3400_s21, %s3400_s21, %s3401_s22  }
  0x16   :  { %s3881_s29 = sld [smem:[#allocation10_spill]] }
  0x1c   :  { %s3350_s30 = scalar_lea.hbm %s3881_s29, 1024 }
  0x1d   :  { %p3351_p8 = scmp.ne.s32.totalorder %s3881_s29, %s3350_s30  ;;  %p3354_p9 = scmp.lt.u32.totalorder %s3350_s30, %s3881_s29 }
  0x1f   :  { %p3356_p10 = pnand %p3354_p9, %p3351_p8 }
  0x21   :  { %3359 = shalt.err (!%p3356_p10)
}
  0x22   :  { %s3360_s20 = scalar_lea.vmem %s3496_s27, 1024  ;;  %p3365_p12 = scmp.lt.s32.totalorder %s3496_s27, %s3496_s27 }
  0x23   :  { %p3361_p11 = scmp.ne.s32.totalorder %s3496_s27, %s3360_s20  ;;  %p3366_p13 = scmp.lt.s32.totalorder %s3360_s20, %s3360_s20 }
  0x25   :  { %p3367_p0 = por %p3366_p13, %p3365_p12 }
  0x27   :  { %p3368_p1 = pnand %p3367_p0, %p3361_p11 }
  0x29   :  { %3371 = shalt.err (!%p3368_p1)
}
  0x2a   :  { %37 = dma.hbm_to_vmem [thread:$0]  %s3881_s29, 1024, %s3496_s27, [#allocation3], %s3400_s21, %s3400_s21, %s3401_s22  }
  0x2b   :  { %s3402_s23 = smov [#allocation6]   ;;  %s3372_s30 = scalar_lea.hbm %s3867_s7, 8192 }
  0x2c   :  { %s63_s24 = sshll.u32 %s3402_s23, 4  ;;  %p3373_p2 = scmp.ne.s32.totalorder %s3867_s7, %s3372_s30  ;;  %s64_s24 = int_to_ptr.vmem [resolvable:$true] %s63_s24 }
  0x2d   :  { %p3376_p3 = scmp.lt.u32.totalorder %s3372_s30, %s3867_s7 }
  0x2f   :  { %p3378_p4 = pnand %p3376_p3, %p3373_p2 }
  0x31   :  { %3381 = shalt.err (!%p3378_p4)
}
  0x32   :  { %s3382_s20 = scalar_lea.vmem %s64_s24, 8192  ;;  %p3387_p6 = scmp.lt.s32.totalorder %s64_s24, %s64_s24 }
  0x33   :  { %p3383_p5 = scmp.ne.s32.totalorder %s64_s24, %s3382_s20  ;;  %p3388_p7 = scmp.lt.s32.totalorder %s3382_s20, %s3382_s20 }
  0x35   :  { %p3389_p8 = por %p3388_p7, %p3387_p6 }
  0x37   :  { %p3390_p9 = pnand %p3389_p8, %p3383_p5 }
  0x39   :  { %3393 = shalt.err (!%p3390_p9)
}
  0x3a   :  { %s3403_s27 = smov 128   ;;  %s3404_s21 = smov 8  }
  0x3b   :  { %69 = dma.hbm_to_vmem [thread:$0]  %s3867_s7, 8192, %s64_s24, [#allocation5], %s3403_s27, %s3403_s27, %s3404_s21  }
  0x3c   :  { %3394 = dma.done.wait [#allocation3], 1024  }
  0x3d   :  { %3395 = vsyncadd [#allocation3], 4294966272 }
  0x3e   :  { %3396 = dma.done.wait [#allocation5], 24576  }
  0x3f   :  { %3397 = vsyncadd [#allocation5], 4294942720  ;;  %v3405_v0 = vmov 0   ;;  %v2930_v1 = vld [vmem:[#allocation2 + $0x4] ss:$16 sps:$4 sm:$0xff]   ;;  %s3882_s23 = sld [smem:[#allocation9_spill]] }
  0x40   :  { %206 = vmatprep.mubr.bf16.mxu0 %v3405_v0  ;;  %247 = vmatprep.mubr.bf16.mxu1 %v3405_v0  ;;  %v2932_v2 = vld [vmem:[#allocation2] ss:$16 sps:$4 sm:$0xff]   ;;  %v2933_v3 = vld [vmem:[#allocation2 + $0x24] ss:$16 sps:$4 sm:$0xff]   ;;  %v2936_v6 = vld [vmem:[#allocation2 + $0xc] ss:$16 sps:$4 sm:$0xff]  }
  0x41   :  { %174 = vmatprep.subr.bf16.mxu0 %v2930_v1  ;;  %v2935_v4 = vld [vmem:[#allocation2 + $0x20] ss:$16 sps:$4 sm:$0xff]   ;;  %v2938_v7 = vld [vmem:[#allocation2 + $0x8] ss:$16 sps:$4 sm:$0xff]   ;;  %215 = vmatprep.subr.bf16.mxu1 %v2936_v6  ;;  %v2939_v8 = vld [vmem:[#allocation2 + $0x2c] ss:$16 sps:$4 sm:$0xff]  }
  0x42   :  { %175 = vmatpush1.bf16.msra.mxu0 %v2932_v2  ;;  %216 = vmatpush1.bf16.msra.mxu1 %v2938_v7  ;;  %v2941_v10 = vld [vmem:[#allocation2 + $0x28] ss:$16 sps:$4 sm:$0xff]   ;;  %v2944_v11 = vld [vmem:[#allocation4 + $0x4] ss:$16 sps:$4 sm:$0xff]   ;;  %vm170_vm0 = vcmask 261120   ;;  %vm2585_vm1 = vcmask 31744  }
  0x43   :  { %176 = vmatprep.subr.bf16.mxu0 %v2933_v3  ;;  %217 = vmatprep.subr.bf16.mxu1 %v2939_v8  ;;  %v2942_v12 = vld [vmem:[#allocation4] ss:$16 sps:$4 sm:$0xff]   ;;  %v2947_v13 = vld [vmem:[#allocation4 + $0xc] ss:$16 sps:$4 sm:$0xff]   ;;  %v2950_v14 = vld [vmem:[#allocation4 + $0x24] ss:$16 sps:$4 sm:$0xff]  }
  0x44   :  { %v2945_v15 = vld [vmem:[#allocation4 + $0x8] ss:$16 sps:$4 sm:$0xff]   ;;  %v2948_v16 = vld [vmem:[#allocation4 + $0x20] ss:$16 sps:$4 sm:$0xff]   ;;  %v2953_v17 = vld [vmem:[#allocation4 + $0x2c] ss:$16 sps:$4 sm:$0xff]  }
  0x45   :  { %v98_v5 = vld [vmem:[%s3882_s23] sm:$0xff]  ;;  %v2951_v19 = vld [vmem:[#allocation4 + $0x28] ss:$16 sps:$4 sm:$0xff]   ;;  %v2959_v21 = vld [vmem:[#allocation4 + $0x4c] ss:$16 sps:$4 sm:$0xff]  }
  0x46   :  { %v108_v9 = vpack.c.bf16 %v98_v5, %v98_v5  ;;  %177 = vmatpush1.bf16.msra.mxu0 %v2935_v4  ;;  %218 = vmatpush1.bf16.msra.mxu1 %v2941_v10  ;;  %v2956_v18 = vld [vmem:[#allocation4 + $0x44] ss:$16 sps:$4 sm:$0xff]   ;;  %v2954_v20 = vld [vmem:[#allocation4 + $0x40] ss:$16 sps:$4 sm:$0xff]   ;;  %v2957_v23 = vld [vmem:[#allocation4 + $0x48] ss:$16 sps:$4 sm:$0xff]  }
  0x47   :  { %1054 = vmatprep.subr.bf16.mxu0 %v2944_v11  ;;  %1136 = vmatprep.subr.bf16.mxu1 %v2947_v13  ;;  %v2962_v22 = vld [vmem:[#allocation4 + $0x64] ss:$16 sps:$4 sm:$0xff]   ;;  %v2960_v24 = vld [vmem:[#allocation4 + $0x60] ss:$16 sps:$4 sm:$0xff]   ;;  %v2965_v25 = vld [vmem:[#allocation4 + $0x6c] ss:$16 sps:$4 sm:$0xff]   ;;  %v110_v13 = vlaneseq }
  0x48   :  { %v2968_v26 = vld [vmem:[#allocation4 + $0x84] ss:$16 sps:$4 sm:$0xff]   ;;  %v2963_v27 = vld [vmem:[#allocation4 + $0x68] ss:$16 sps:$4 sm:$0xff]   ;;  %v2966_v28 = vld [vmem:[#allocation4 + $0x80] ss:$16 sps:$4 sm:$0xff]  }
  0x49   :  { %2601 = vmatmul.mubr.msk.bf16.vlgmr.msra.gmra.mrb[0].mxu0 %vm170_vm0, %v108_v9  ;;  %2602 = vmatmul.mubr.msk.bf16.vlgmr.msra.gmra.mrb[0].mxu1 %vm170_vm0, %v108_v9  ;;  %v2971_v29 = vld [vmem:[#allocation4 + $0x8c] ss:$16 sps:$4 sm:$0xff]   ;;  %v2974_v30 = vld [vmem:[#allocation4 + $0xa4] ss:$16 sps:$4 sm:$0xff]   ;;  %v2969_v31 = vld [vmem:[#allocation4 + $0x88] ss:$16 sps:$4 sm:$0xff]  }
  0x4a   :  { %1055 = vmatpush1.bf16.msra.mxu0 %v2942_v12  ;;  %1137 = vmatpush1.bf16.msra.mxu1 %v2945_v15  ;;  %v2972_v32 = vld [vmem:[#allocation4 + $0xa0] ss:$16 sps:$4 sm:$0xff]   ;;  %v2977_v33 = vld [vmem:[#allocation4 + $0xac] ss:$16 sps:$4 sm:$0xff]   ;;  %v2980_v34 = vld [vmem:[#allocation4 + $0xc4] ss:$16 sps:$4 sm:$0xff]  }
  0x4b   :  { %1056 = vmatprep.subr.bf16.mxu0 %v2950_v14  ;;  %1138 = vmatprep.subr.bf16.mxu1 %v2953_v17  ;;  %v2975_v35 = vld [vmem:[#allocation4 + $0xa8] ss:$16 sps:$4 sm:$0xff]   ;;  %v2978_v36 = vld [vmem:[#allocation4 + $0xc0] ss:$16 sps:$4 sm:$0xff]   ;;  %v2983_v37 = vld [vmem:[#allocation4 + $0xcc] ss:$16 sps:$4 sm:$0xff]  }
  0x4c   :  { %v2986_v38 = vld [vmem:[#allocation4 + $0xe4] ss:$16 sps:$4 sm:$0xff]   ;;  %v2981_v39 = vld [vmem:[#allocation4 + $0xc8] ss:$16 sps:$4 sm:$0xff]   ;;  %v2984_v40 = vld [vmem:[#allocation4 + $0xe0] ss:$16 sps:$4 sm:$0xff]  }
  0x4d   :  { %v2989_v41 = vld [vmem:[#allocation4 + $0xec] ss:$16 sps:$4 sm:$0xff]   ;;  %v2992_v42 = vld [vmem:[#allocation4 + $0x104] ss:$16 sps:$4 sm:$0xff]   ;;  %v2987_v43 = vld [vmem:[#allocation4 + $0xe8] ss:$16 sps:$4 sm:$0xff]  }
  0x4e   :  { %1057 = vmatpush1.bf16.msra.mxu0 %v2948_v16  ;;  %1139 = vmatpush1.bf16.msra.mxu1 %v2951_v19  ;;  %v2990_v44 = vld [vmem:[#allocation4 + $0x100] ss:$16 sps:$4 sm:$0xff]   ;;  %v2995_v45 = vld [vmem:[#allocation4 + $0x10c] ss:$16 sps:$4 sm:$0xff]   ;;  %v2998_v46 = vld [vmem:[#allocation4 + $0x124] ss:$16 sps:$4 sm:$0xff]  }
  0x4f   :  { %1058 = vmatprep.subr.bf16.mxu0 %v2956_v18  ;;  %1140 = vmatprep.subr.bf16.mxu1 %v2959_v21  ;;  %v2993_v47 = vld [vmem:[#allocation4 + $0x108] ss:$16 sps:$4 sm:$0xff]   ;;  %v2996_v48 = vld [vmem:[#allocation4 + $0x120] ss:$16 sps:$4 sm:$0xff]   ;;  %v3001_v49 = vld [vmem:[#allocation4 + $0x12c] ss:$16 sps:$4 sm:$0xff]  }
  0x50   :  { %v3004_v50 = vld [vmem:[#allocation4 + $0x144] ss:$16 sps:$4 sm:$0xff]   ;;  %v2999_v51 = vld [vmem:[#allocation4 + $0x128] ss:$16 sps:$4 sm:$0xff]   ;;  %v3002_v52 = vld [vmem:[#allocation4 + $0x140] ss:$16 sps:$4 sm:$0xff]  }
  0x51   :  { %v3007_v53 = vld [vmem:[#allocation4 + $0x14c] ss:$16 sps:$4 sm:$0xff]   ;;  %v3010_v54 = vld [vmem:[#allocation4 + $0x164] ss:$16 sps:$4 sm:$0xff]   ;;  %v3005_v55 = vld [vmem:[#allocation4 + $0x148] ss:$16 sps:$4 sm:$0xff]  }
  0x52   :  { %1059 = vmatpush1.bf16.msra.mxu0 %v2954_v20  ;;  %1141 = vmatpush1.bf16.msra.mxu1 %v2957_v23  ;;  %v3008_v56 = vld [vmem:[#allocation4 + $0x160] ss:$16 sps:$4 sm:$0xff]   ;;  %v3013_v57 = vld [vmem:[#allocation4 + $0x16c] ss:$16 sps:$4 sm:$0xff]   ;;  %v3016_v58 = vld [vmem:[#allocation4 + $0x184] ss:$16 sps:$4 sm:$0xff]  }
  0x53   :  { %1060 = vmatprep.subr.bf16.mxu0 %v2962_v22  ;;  %1142 = vmatprep.subr.bf16.mxu1 %v2965_v25  ;;  %v3011_v59 = vld [vmem:[#allocation4 + $0x168] ss:$16 sps:$4 sm:$0xff]   ;;  %v3014_v60 = vld [vmem:[#allocation4 + $0x180] ss:$16 sps:$4 sm:$0xff]   ;;  %v3019_v61 = vld [vmem:[#allocation4 + $0x18c] ss:$16 sps:$4 sm:$0xff]  }
  0x54   :  { %v3022_v62 = vld [vmem:[#allocation4 + $0x1a4] ss:$16 sps:$4 sm:$0xff]   ;;  %v3017_v63 = vld [vmem:[#allocation4 + $0x188] ss:$16 sps:$4 sm:$0xff]   ;;  %v3020_v0 = vld [vmem:[#allocation4 + $0x1a0] ss:$16 sps:$4 sm:$0xff]  }
  0x55   :  { %v3025_v1 = vld [vmem:[#allocation4 + $0x1ac] ss:$16 sps:$4 sm:$0xff]   ;;  %v3023_v2 = vld [vmem:[#allocation4 + $0x1a8] ss:$16 sps:$4 sm:$0xff]   ;;  %v3028_v3 = vld [vmem:[#allocation4 + $0x1c4] ss:$16 sps:$4 sm:$0xff]  }
  0x56   :  { %1061 = vmatpush1.bf16.msra.mxu0 %v2960_v24  ;;  %1143 = vmatpush1.bf16.msra.mxu1 %v2963_v27  ;;  %v3031_v4 = vld [vmem:[#allocation4 + $0x1cc] ss:$16 sps:$4 sm:$0xff]   ;;  %v3026_v5 = vld [vmem:[#allocation4 + $0x1c0] ss:$16 sps:$4 sm:$0xff]   ;;  %v3029_v6 = vld [vmem:[#allocation4 + $0x1c8] ss:$16 sps:$4 sm:$0xff]  }
  0x57   :  { %1062 = vmatprep.subr.bf16.mxu0 %v2968_v26  ;;  %1144 = vmatprep.subr.bf16.mxu1 %v2971_v29  ;;  %v3034_v7 = vld [vmem:[#allocation4 + $0x1e4] ss:$16 sps:$4 sm:$0xff]   ;;  %v3037_v8 = vld [vmem:[#allocation4 + $0x1ec] ss:$16 sps:$4 sm:$0xff]   ;;  %v3032_v9 = vld [vmem:[#allocation4 + $0x1e0] ss:$16 sps:$4 sm:$0xff]  }
  0x58   :  { %v3035_v10 = vld [vmem:[#allocation4 + $0x1e8] ss:$16 sps:$4 sm:$0xff]   ;;  %v3040_v11 = vld [vmem:[#allocation4 + $0x204] ss:$16 sps:$4 sm:$0xff]   ;;  %v3043_v12 = vld [vmem:[#allocation4 + $0x20c] ss:$16 sps:$4 sm:$0xff]  }
  0x59   :  { %v3542_v14 = vshrl.u32 %v110_v13, 7  ;;  %v3550_v16 = vld [vmem:[%s3862_s2] sm:$0xf]  ;;  %v3100_v13 = vld [vmem:[#allocation4 + $0x344] ss:$16 sps:$4 sm:$0xff]  }
  0x5a   :  { %1063 = vmatpush1.bf16.msra.mxu0 %v2966_v28  ;;  %1145 = vmatpush1.bf16.msra.mxu1 %v2969_v31 }
  0x5b   :  { %1064 = vmatprep.subr.bf16.mxu0 %v2974_v30  ;;  %1146 = vmatprep.subr.bf16.mxu1 %v2977_v33  ;;  %v3545_v15 = vsub.s32 0, %v3542_v14  ;;  %v3553_v17 = vsub.s32 1, %v3542_v14  ;;  %v3558_v19 = vsub.s32 3, %v3542_v14 }
  0x5d   :  { %v113_v18 = vrot.slane %v3550_v16, %v3545_v15  ;;  %v117_v20 = vrot.slane %v3550_v16, %v3553_v17  ;;  %v125_v24 = vrot.slane %v3550_v16, %v3558_v19 }
  0x5e   :  { %1065 = vmatpush1.bf16.msra.mxu0 %v2972_v32  ;;  %1147 = vmatpush1.bf16.msra.mxu1 %v2975_v35  ;;  %v3038_v35 = vld [vmem:[#allocation4 + $0x200] ss:$16 sps:$4 sm:$0xff]  }
  0x5f   :  { %1066 = vmatprep.subr.bf16.mxu0 %v2980_v34  ;;  %1148 = vmatprep.subr.bf16.mxu1 %v2983_v37 }
  0x62   :  { %1067 = vmatpush1.bf16.msra.mxu0 %v2978_v36  ;;  %1149 = vmatpush1.bf16.msra.mxu1 %v2981_v39  ;;  %v3041_v36 = vld [vmem:[#allocation4 + $0x208] ss:$16 sps:$4 sm:$0xff]   ;;  %v3046_v39 = vld [vmem:[#allocation4 + $0x224] ss:$16 sps:$4 sm:$0xff]  }
  0x63   :  { %1068 = vmatprep.subr.bf16.mxu0 %v2986_v38  ;;  %1150 = vmatprep.subr.bf16.mxu1 %v2989_v41 }
  0x66   :  { %1069 = vmatpush1.bf16.msra.mxu0 %v2984_v40  ;;  %1151 = vmatpush1.bf16.msra.mxu1 %v2987_v43  ;;  %v3049_v40 = vld [vmem:[#allocation4 + $0x22c] ss:$16 sps:$4 sm:$0xff]   ;;  %v3044_v43 = vld [vmem:[#allocation4 + $0x220] ss:$16 sps:$4 sm:$0xff]  }
  0x67   :  { %1070 = vmatprep.subr.bf16.mxu0 %v2992_v42  ;;  %1152 = vmatprep.subr.bf16.mxu1 %v2995_v45  ;;  %v3052_v45 = vld [vmem:[#allocation4 + $0x244] ss:$16 sps:$4 sm:$0xff]  }
  0x6a   :  { %1071 = vmatpush1.bf16.msra.mxu0 %v2990_v44  ;;  %1153 = vmatpush1.bf16.msra.mxu1 %v2993_v47  ;;  %v3047_v44 = vld [vmem:[#allocation4 + $0x228] ss:$16 sps:$4 sm:$0xff]   ;;  %v3050_v47 = vld [vmem:[#allocation4 + $0x240] ss:$16 sps:$4 sm:$0xff]  }
  0x6b   :  { %1072 = vmatprep.subr.bf16.mxu0 %v2998_v46  ;;  %1154 = vmatprep.subr.bf16.mxu1 %v3001_v49  ;;  %v3055_v46 = vld [vmem:[#allocation4 + $0x24c] ss:$16 sps:$4 sm:$0xff]   ;;  %v3058_v49 = vld [vmem:[#allocation4 + $0x264] ss:$16 sps:$4 sm:$0xff]  }
  0x6e   :  { %1073 = vmatpush1.bf16.msra.mxu0 %v2996_v48  ;;  %1155 = vmatpush1.bf16.msra.mxu1 %v2999_v51  ;;  %v3053_v48 = vld [vmem:[#allocation4 + $0x248] ss:$16 sps:$4 sm:$0xff]   ;;  %v3056_v51 = vld [vmem:[#allocation4 + $0x260] ss:$16 sps:$4 sm:$0xff]  }
  0x6f   :  { %1074 = vmatprep.subr.bf16.mxu0 %v3004_v50  ;;  %1156 = vmatprep.subr.bf16.mxu1 %v3007_v53  ;;  %v3061_v50 = vld [vmem:[#allocation4 + $0x26c] ss:$16 sps:$4 sm:$0xff]   ;;  %v3064_v53 = vld [vmem:[#allocation4 + $0x284] ss:$16 sps:$4 sm:$0xff]  }
  0x72   :  { %1075 = vmatpush1.bf16.msra.mxu0 %v3002_v52  ;;  %1157 = vmatpush1.bf16.msra.mxu1 %v3005_v55  ;;  %v3059_v52 = vld [vmem:[#allocation4 + $0x268] ss:$16 sps:$4 sm:$0xff]   ;;  %v3062_v55 = vld [vmem:[#allocation4 + $0x280] ss:$16 sps:$4 sm:$0xff]  }
  0x73   :  { %1076 = vmatprep.subr.bf16.mxu0 %v3010_v54  ;;  %1158 = vmatprep.subr.bf16.mxu1 %v3013_v57  ;;  %v3067_v54 = vld [vmem:[#allocation4 + $0x28c] ss:$16 sps:$4 sm:$0xff]   ;;  %v3070_v57 = vld [vmem:[#allocation4 + $0x2a4] ss:$16 sps:$4 sm:$0xff]  }
  0x76   :  { %1077 = vmatpush1.bf16.msra.mxu0 %v3008_v56  ;;  %1159 = vmatpush1.bf16.msra.mxu1 %v3011_v59  ;;  %v3065_v56 = vld [vmem:[#allocation4 + $0x288] ss:$16 sps:$4 sm:$0xff]   ;;  %v3068_v59 = vld [vmem:[#allocation4 + $0x2a0] ss:$16 sps:$4 sm:$0xff]  }
  0x77   :  { %1078 = vmatprep.subr.bf16.mxu0 %v3016_v58  ;;  %1160 = vmatprep.subr.bf16.mxu1 %v3019_v61  ;;  %v3073_v58 = vld [vmem:[#allocation4 + $0x2ac] ss:$16 sps:$4 sm:$0xff]   ;;  %v3076_v61 = vld [vmem:[#allocation4 + $0x2c4] ss:$16 sps:$4 sm:$0xff]  }
  0x7a   :  { %1079 = vmatpush1.bf16.msra.mxu0 %v3014_v60  ;;  %1161 = vmatpush1.bf16.msra.mxu1 %v3017_v63  ;;  %v3071_v60 = vld [vmem:[#allocation4 + $0x2a8] ss:$16 sps:$4 sm:$0xff]   ;;  %v3074_v63 = vld [vmem:[#allocation4 + $0x2c0] ss:$16 sps:$4 sm:$0xff]  }
  0x7b   :  { %1080 = vmatprep.subr.bf16.mxu0 %v3022_v62  ;;  %1162 = vmatprep.subr.bf16.mxu1 %v3025_v1  ;;  %v3079_v62 = vld [vmem:[#allocation4 + $0x2cc] ss:$16 sps:$4 sm:$0xff]   ;;  %v3082_v1 = vld [vmem:[#allocation4 + $0x2e4] ss:$16 sps:$4 sm:$0xff]  }
  0x7e   :  { %1081 = vmatpush1.bf16.msra.mxu0 %v3020_v0  ;;  %1163 = vmatpush1.bf16.msra.mxu1 %v3023_v2  ;;  %v3077_v0 = vld [vmem:[#allocation4 + $0x2c8] ss:$16 sps:$4 sm:$0xff]   ;;  %v3085_v2 = vld [vmem:[#allocation4 + $0x2ec] ss:$16 sps:$4 sm:$0xff]  }
  0x7f   :  { %1082 = vmatprep.subr.bf16.mxu0 %v3028_v3  ;;  %1164 = vmatprep.subr.bf16.mxu1 %v3031_v4  ;;  %v3080_v3 = vld [vmem:[#allocation4 + $0x2e0] ss:$16 sps:$4 sm:$0xff]   ;;  %v3083_v4 = vld [vmem:[#allocation4 + $0x2e8] ss:$16 sps:$4 sm:$0xff]  }
  0x82   :  { %1083 = vmatpush1.bf16.msra.mxu0 %v3026_v5  ;;  %1165 = vmatpush1.bf16.msra.mxu1 %v3029_v6  ;;  %v3088_v5 = vld [vmem:[#allocation4 + $0x304] ss:$16 sps:$4 sm:$0xff]   ;;  %v3091_v6 = vld [vmem:[#allocation4 + $0x30c] ss:$16 sps:$4 sm:$0xff]  }
  0x83   :  { %1084 = vmatprep.subr.bf16.mxu0 %v3034_v7  ;;  %1166 = vmatprep.subr.bf16.mxu1 %v3037_v8  ;;  %v3086_v7 = vld [vmem:[#allocation4 + $0x300] ss:$16 sps:$4 sm:$0xff]   ;;  %v3089_v8 = vld [vmem:[#allocation4 + $0x308] ss:$16 sps:$4 sm:$0xff]  }
  0x86   :  { %1085 = vmatpush1.bf16.msra.mxu0 %v3032_v9  ;;  %1167 = vmatpush1.bf16.msra.mxu1 %v3035_v10  ;;  %v3094_v9 = vld [vmem:[#allocation4 + $0x324] ss:$16 sps:$4 sm:$0xff]   ;;  %v3097_v10 = vld [vmem:[#allocation4 + $0x32c] ss:$16 sps:$4 sm:$0xff]  }
  0x87   :  { %1095 = vmatprep.subr.bf16.mxu0 %v3040_v11  ;;  %1177 = vmatprep.subr.bf16.mxu1 %v3043_v12  ;;  %v3092_v11 = vld [vmem:[#allocation4 + $0x320] ss:$16 sps:$4 sm:$0xff]   ;;  %v3095_v12 = vld [vmem:[#allocation4 + $0x328] ss:$16 sps:$4 sm:$0xff]  }
 0x11c   :  { %v208_v21 = vpop.f32.mrb[0].mxu0  ;;  %v3564_v29 = vpop.f32.mrb[0].mxu1 }
 0x11d   :  { %v209_v22 = vadd.f32 %v208_v21, %v113_v18  ;;  %v210_v23 = vpop.f32.mrb[1].mxu0  ;;  %v251_v31 = vpop.f32.mrb[1].mxu1  ;;  %v3103_v18 = vld [vmem:[#allocation4 + $0x34c] ss:$16 sps:$4 sm:$0xff]   ;;  %v3101_v21 = vld [vmem:[#allocation4 + $0x348] ss:$16 sps:$4 sm:$0xff]  }
 0x11e   :  { %v211_v25 = vadd.f32 %v210_v23, %v117_v20  ;;  %v212_v26 = vpop.f32.mrb[2].mxu0  ;;  %v252_v32 = vadd.f32 %v251_v31, %v125_v24  ;;  %v253_v33 = vpop.f32.mrb[2].mxu1  ;;  %v3098_v20 = vld [vmem:[#allocation4 + $0x340] ss:$16 sps:$4 sm:$0xff]   ;;  %v3109_v23 = vld [vmem:[#allocation4 + $0x36c] ss:$16 sps:$4 sm:$0xff]  }
 0x11f   :  { %v256_v27 = vmax.f32 %v209_v22, 0.0  ;;  %v213_v28 = vpop.f32.mrb[3].mxu0  ;;  %v254_v37 = vpop.f32.mrb[3].mxu1  ;;  %v3106_v22 = vld [vmem:[#allocation4 + $0x364] ss:$16 sps:$4 sm:$0xff]   ;;  %v3567_v31 = vsub.s32 2, %v3542_v14 }
 0x120   :  { %v257_v30 = vmax.f32 %v211_v25, 0.0  ;;  %v259_v41 = vmax.f32 %v252_v32, 0.0  ;;  %v3104_v24 = vld [vmem:[#allocation4 + $0x360] ss:$16 sps:$4 sm:$0xff]   ;;  %v3107_v25 = vld [vmem:[#allocation4 + $0x368] ss:$16 sps:$4 sm:$0xff]  }
 0x121   :  { %v389_v38 = vpack.c.bf16 %v256_v27, %v256_v27  ;;  %v3112_v26 = vld [vmem:[#allocation4 + $0x384] ss:$16 sps:$4 sm:$0xff]   ;;  %v3115_v27 = vld [vmem:[#allocation4 + $0x38c] ss:$16 sps:$4 sm:$0xff]   ;;  %v3110_v28 = vld [vmem:[#allocation4 + $0x380] ss:$16 sps:$4 sm:$0xff]  }
 0x122   :  { %v390_v34 = vpack.c.bf16 %v257_v30, %v257_v30  ;;  %v392_v42 = vpack.c.bf16 %v259_v41, %v259_v41  ;;  %v3113_v30 = vld [vmem:[#allocation4 + $0x388] ss:$16 sps:$4 sm:$0xff]   ;;  %v3118_v32 = vld [vmem:[#allocation4 + $0x3a4] ss:$16 sps:$4 sm:$0xff]   ;;  %v3121_v33 = vld [vmem:[#allocation4 + $0x3ac] ss:$16 sps:$4 sm:$0xff]  }
 0x123   :  { %v3124_v37 = vld [vmem:[#allocation4 + $0x3c4] ss:$16 sps:$4 sm:$0xff]  }
 0x124   :  { %1086 = vmatprep.mubr.bf16.mxu0 %v390_v34  ;;  %1168 = vmatprep.mubr.bf16.mxu1 %v390_v34  ;;  %v3116_v34 = vld [vmem:[#allocation4 + $0x3a0] ss:$16 sps:$4 sm:$0xff]   ;;  %v3130_v41 = vld [vmem:[#allocation4 + $0x3e4] ss:$16 sps:$4 sm:$0xff]  }
 0x125   :  { %1087 = vmatmul.mubr.bf16.vlgmr.msra.gmra.mrb[4].mxu0 %v389_v38  ;;  %1169 = vmatmul.mubr.bf16.vlgmr.msra.gmra.mrb[4].mxu1 %v389_v38  ;;  %v3127_v38 = vld [vmem:[#allocation4 + $0x3cc] ss:$16 sps:$4 sm:$0xff]  }
 0x126   :  { %1096 = vmatpush1.bf16.msra.mxu0 %v3038_v35  ;;  %1178 = vmatpush1.bf16.msra.mxu1 %v3041_v36  ;;  %v3119_v35 = vld [vmem:[#allocation4 + $0x3a8] ss:$16 sps:$4 sm:$0xff]   ;;  %v121_v36 = vrot.slane %v3550_v16, %v3567_v31  ;;  %v3136_v16 = vld [vmem:[#allocation6 + $0x4] ss:$8 sps:$4 sm:$0xff]  }
 0x127   :  { %1097 = vmatprep.subr.bf16.mxu0 %v3046_v39  ;;  %1179 = vmatprep.subr.bf16.mxu1 %v3049_v40  ;;  %v3122_v39 = vld [vmem:[#allocation4 + $0x3c0] ss:$16 sps:$4 sm:$0xff]   ;;  %v3125_v40 = vld [vmem:[#allocation4 + $0x3c8] ss:$16 sps:$4 sm:$0xff]  }
 0x128   :  { %1127 = vmatprep.mubr.bf16.mxu0 %v392_v42  ;;  %1209 = vmatprep.mubr.bf16.mxu1 %v392_v42  ;;  %v250_v14 = vadd.f32 %v3564_v29, %v121_v36  ;;  %v3133_v42 = vld [vmem:[#allocation4 + $0x3ec] ss:$16 sps:$4 sm:$0xff]   ;;  %v3137_v29 = vld [vmem:[#allocation6 + $0x10] ss:$8 sps:$4 sm:$0xff]  }
 0x12a   :  { %1098 = vmatpush1.bf16.msra.mxu0 %v3044_v43  ;;  %1180 = vmatpush1.bf16.msra.mxu1 %v3047_v44  ;;  %v3128_v43 = vld [vmem:[#allocation4 + $0x3e0] ss:$16 sps:$4 sm:$0xff]   ;;  %v3131_v44 = vld [vmem:[#allocation4 + $0x3e8] ss:$16 sps:$4 sm:$0xff]  }
 0x12b   :  { %1099 = vmatprep.subr.bf16.mxu0 %v3052_v45  ;;  %1181 = vmatprep.subr.bf16.mxu1 %v3055_v46  ;;  %v258_v45 = vmax.f32 %v250_v14, 0.0  ;;  %v3134_v46 = vld [vmem:[#allocation6] ss:$8 sps:$4 sm:$0xff]  }
 0x12e   :  { %1100 = vmatpush1.bf16.msra.mxu0 %v3050_v47  ;;  %1182 = vmatpush1.bf16.msra.mxu1 %v3053_v48  ;;  %v391_v47 = vpack.c.bf16 %v258_v45, %v258_v45  ;;  %v3139_v48 = vld [vmem:[#allocation6 + $0x14] ss:$8 sps:$4 sm:$0xff]  }
 0x12f   :  { %1101 = vmatprep.subr.bf16.mxu0 %v3058_v49  ;;  %1183 = vmatprep.subr.bf16.mxu1 %v3061_v50  ;;  %v3142_v49 = vld [vmem:[#allocation6 + $0x24] ss:$8 sps:$4 sm:$0xff]   ;;  %v3140_v50 = vld [vmem:[#allocation6 + $0x20] ss:$8 sps:$4 sm:$0xff]  }
 0x132   :  { %1102 = vmatpush1.bf16.msra.mxu0 %v3056_v51  ;;  %1184 = vmatpush1.bf16.msra.mxu1 %v3059_v52  ;;  %v3145_v51 = vld [vmem:[#allocation6 + $0x34] ss:$8 sps:$4 sm:$0xff]   ;;  %v3143_v52 = vld [vmem:[#allocation6 + $0x30] ss:$8 sps:$4 sm:$0xff]  }
 0x133   :  { %1103 = vmatprep.subr.bf16.mxu0 %v3064_v53  ;;  %1185 = vmatprep.subr.bf16.mxu1 %v3067_v54  ;;  %v3148_v53 = vld [vmem:[#allocation6 + $0x44] ss:$8 sps:$4 sm:$0xff]   ;;  %v3146_v54 = vld [vmem:[#allocation6 + $0x40] ss:$8 sps:$4 sm:$0xff]  }
 0x136   :  { %1104 = vmatpush1.bf16.msra.mxu0 %v3062_v55  ;;  %1186 = vmatpush1.bf16.msra.mxu1 %v3065_v56  ;;  %v3151_v55 = vld [vmem:[#allocation6 + $0x54] ss:$8 sps:$4 sm:$0xff]   ;;  %v3149_v56 = vld [vmem:[#allocation6 + $0x50] ss:$8 sps:$4 sm:$0xff]  }
 0x137   :  { %1105 = vmatprep.subr.bf16.mxu0 %v3070_v57  ;;  %1187 = vmatprep.subr.bf16.mxu1 %v3073_v58  ;;  %v3154_v57 = vld [vmem:[#allocation6 + $0x64] ss:$8 sps:$4 sm:$0xff]   ;;  %v3152_v58 = vld [vmem:[#allocation6 + $0x60] ss:$8 sps:$4 sm:$0xff]  }
 0x13a   :  { %1106 = vmatpush1.bf16.msra.mxu0 %v3068_v59  ;;  %1188 = vmatpush1.bf16.msra.mxu1 %v3071_v60  ;;  %v3157_v59 = vld [vmem:[#allocation6 + $0x74] ss:$8 sps:$4 sm:$0xff]   ;;  %v3155_v60 = vld [vmem:[#allocation6 + $0x70] ss:$8 sps:$4 sm:$0xff]  }
 0x13b   :  { %1107 = vmatprep.subr.bf16.mxu0 %v3076_v61  ;;  %1189 = vmatprep.subr.bf16.mxu1 %v3079_v62  ;;  %v3160_v61 = vld [vmem:[#allocation6 + $0x84] ss:$8 sps:$4 sm:$0xff]   ;;  %v3158_v62 = vld [vmem:[#allocation6 + $0x80] ss:$8 sps:$4 sm:$0xff]  }
 0x13e   :  { %1108 = vmatpush1.bf16.msra.mxu0 %v3074_v63  ;;  %1190 = vmatpush1.bf16.msra.mxu1 %v3077_v0  ;;  %v3163_v63 = vld [vmem:[#allocation6 + $0x94] ss:$8 sps:$4 sm:$0xff]   ;;  %v3161_v0 = vld [vmem:[#allocation6 + $0x90] ss:$8 sps:$4 sm:$0xff]  }
 0x13f   :  { %1109 = vmatprep.subr.bf16.mxu0 %v3082_v1  ;;  %1191 = vmatprep.subr.bf16.mxu1 %v3085_v2  ;;  %v3166_v1 = vld [vmem:[#allocation6 + $0xa4] ss:$8 sps:$4 sm:$0xff]   ;;  %v3164_v2 = vld [vmem:[#allocation6 + $0xa0] ss:$8 sps:$4 sm:$0xff]  }
 0x142   :  { %1110 = vmatpush1.bf16.msra.mxu0 %v3080_v3  ;;  %1192 = vmatpush1.bf16.msra.mxu1 %v3083_v4  ;;  %v3169_v3 = vld [vmem:[#allocation6 + $0xb4] ss:$8 sps:$4 sm:$0xff]   ;;  %v3167_v4 = vld [vmem:[#allocation6 + $0xb0] ss:$8 sps:$4 sm:$0xff]  }
 0x143   :  { %1111 = vmatprep.subr.bf16.mxu0 %v3088_v5  ;;  %1193 = vmatprep.subr.bf16.mxu1 %v3091_v6  ;;  %v3172_v5 = vld [vmem:[#allocation6 + $0xc4] ss:$8 sps:$4 sm:$0xff]   ;;  %v3170_v6 = vld [vmem:[#allocation6 + $0xc0] ss:$8 sps:$4 sm:$0xff]  }
 0x146   :  { %1112 = vmatpush1.bf16.msra.mxu0 %v3086_v7  ;;  %1194 = vmatpush1.bf16.msra.mxu1 %v3089_v8  ;;  %v3175_v7 = vld [vmem:[#allocation6 + $0xd4] ss:$8 sps:$4 sm:$0xff]   ;;  %v3173_v8 = vld [vmem:[#allocation6 + $0xd0] ss:$8 sps:$4 sm:$0xff]  }
 0x147   :  { %1113 = vmatprep.subr.bf16.mxu0 %v3094_v9  ;;  %1195 = vmatprep.subr.bf16.mxu1 %v3097_v10  ;;  %v3178_v9 = vld [vmem:[#allocation6 + $0xe4] ss:$8 sps:$4 sm:$0xff]   ;;  %v3176_v10 = vld [vmem:[#allocation6 + $0xe0] ss:$8 sps:$4 sm:$0xff]  }
 0x14a   :  { %1114 = vmatpush1.bf16.msra.mxu0 %v3092_v11  ;;  %1196 = vmatpush1.bf16.msra.mxu1 %v3095_v12  ;;  %v3181_v11 = vld [vmem:[#allocation6 + $0xf4] ss:$8 sps:$4 sm:$0xff]   ;;  %v3179_v12 = vld [vmem:[#allocation6 + $0xf0] ss:$8 sps:$4 sm:$0xff]  }
 0x14b   :  { %1115 = vmatprep.subr.bf16.mxu0 %v3100_v13  ;;  %1197 = vmatprep.subr.bf16.mxu1 %v3103_v18  ;;  %v3184_v13 = vld [vmem:[#allocation6 + $0x104] ss:$8 sps:$4 sm:$0xff]   ;;  %v3230_v18 = vld [vmem:[%s3871_s11] ss:$8 sps:$4 sm:$0xff]  }
 0x14e   :  { %1116 = vmatpush1.bf16.msra.mxu0 %v3098_v20  ;;  %1198 = vmatpush1.bf16.msra.mxu1 %v3101_v21  ;;  %v3232_v20 = vld [vmem:[%s3871_s11 + $0x4] ss:$8 sps:$4 sm:$0xff]   ;;  %v3235_v21 = vld [vmem:[%s3871_s11 + $0x14] ss:$8 sps:$4 sm:$0xff]  }
 0x14f   :  { %1117 = vmatprep.subr.bf16.mxu0 %v3106_v22  ;;  %1199 = vmatprep.subr.bf16.mxu1 %v3109_v23  ;;  %v3233_v22 = vld [vmem:[%s3871_s11 + $0x10] ss:$8 sps:$4 sm:$0xff]   ;;  %v3238_v23 = vld [vmem:[%s3871_s11 + $0x24] ss:$8 sps:$4 sm:$0xff]  }
 0x152   :  { %1118 = vmatpush1.bf16.msra.mxu0 %v3104_v24  ;;  %1200 = vmatpush1.bf16.msra.mxu1 %v3107_v25  ;;  %v3236_v24 = vld [vmem:[%s3871_s11 + $0x20] ss:$8 sps:$4 sm:$0xff]   ;;  %v3241_v25 = vld [vmem:[%s3871_s11 + $0x34] ss:$8 sps:$4 sm:$0xff]  }
 0x153   :  { %1119 = vmatprep.subr.bf16.mxu0 %v3112_v26  ;;  %1201 = vmatprep.subr.bf16.mxu1 %v3115_v27  ;;  %v388_v26 = vld [vmem:[%s3864_s4] sm:$0xf]  ;;  %v3239_v27 = vld [vmem:[%s3871_s11 + $0x30] ss:$8 sps:$4 sm:$0xff]  }
 0x156   :  { %1120 = vmatpush1.bf16.msra.mxu0 %v3110_v28  ;;  %1202 = vmatpush1.bf16.msra.mxu1 %v3113_v30  ;;  %v397_v28 = vrot.slane %v388_v26, %v3545_v15  ;;  %v405_v30 = vrot.slane %v388_v26, %v3567_v31 }
 0x157   :  { %1121 = vmatprep.subr.bf16.mxu0 %v3118_v32  ;;  %1203 = vmatprep.subr.bf16.mxu1 %v3121_v33  ;;  %v401_v32 = vrot.slane %v388_v26, %v3553_v17  ;;  %v409_v33 = vrot.slane %v388_v26, %v3558_v19 }
 0x15a   :  { %1122 = vmatpush1.bf16.msra.mxu0 %v3116_v34  ;;  %1204 = vmatpush1.bf16.msra.mxu1 %v3119_v35 }
 0x15b   :  { %1123 = vmatprep.subr.bf16.mxu0 %v3124_v37  ;;  %1205 = vmatprep.subr.bf16.mxu1 %v3127_v38 }
 0x15e   :  { %1124 = vmatpush1.bf16.msra.mxu0 %v3122_v39  ;;  %1206 = vmatpush1.bf16.msra.mxu1 %v3125_v40 }
 0x15f   :  { %1125 = vmatprep.subr.bf16.mxu0 %v3130_v41  ;;  %1207 = vmatprep.subr.bf16.mxu1 %v3133_v42 }
 0x162   :  { %1126 = vmatpush1.bf16.msra.mxu0 %v3128_v43  ;;  %1208 = vmatpush1.bf16.msra.mxu1 %v3131_v44 }
 0x163   :  { %1762 = vmatprep.subr.bf16.mxu0 %v3136_v16  ;;  %2124 = vmatprep.subr.bf16.mxu1 %v3232_v20 }
 0x165   :  { %1128 = vmatmul.mubr.bf16.vlgmr.msra.gmra.mrb[4].mxu0 %v391_v47  ;;  %1210 = vmatmul.mubr.bf16.vlgmr.msra.gmra.mrb[4].mxu1 %v391_v47 }
 0x166   :  { %1763 = vmatpush1.bf16.msra.mxu0 %v3134_v46  ;;  %2125 = vmatpush1.bf16.msra.mxu1 %v3230_v18 }
 0x167   :  { %1764 = vmatprep.subr.bf16.mxu0 %v3139_v48  ;;  %2126 = vmatprep.subr.bf16.mxu1 %v3235_v21 }
 0x16a   :  { %1765 = vmatpush1.bf16.msra.mxu0 %v3137_v29  ;;  %2127 = vmatpush1.bf16.msra.mxu1 %v3233_v22 }
 0x16b   :  { %1766 = vmatprep.subr.bf16.mxu0 %v3142_v49  ;;  %2128 = vmatprep.subr.bf16.mxu1 %v3238_v23 }
 0x16e   :  { %1767 = vmatpush1.bf16.msra.mxu0 %v3140_v50  ;;  %2129 = vmatpush1.bf16.msra.mxu1 %v3236_v24 }
 0x16f   :  { %1768 = vmatprep.subr.bf16.mxu0 %v3145_v51  ;;  %2130 = vmatprep.subr.bf16.mxu1 %v3241_v25 }
 0x172   :  { %1769 = vmatpush1.bf16.msra.mxu0 %v3143_v52  ;;  %2131 = vmatpush1.bf16.msra.mxu1 %v3239_v27 }
 0x173   :  { %1770 = vmatprep.subr.bf16.mxu0 %v3148_v53 }
 0x176   :  { %1771 = vmatpush1.bf16.msra.mxu0 %v3146_v54 }
 0x177   :  { %1772 = vmatprep.subr.bf16.mxu0 %v3151_v55 }
 0x17a   :  { %1773 = vmatpush1.bf16.msra.mxu0 %v3149_v56 }
 0x17b   :  { %1774 = vmatprep.subr.bf16.mxu0 %v3154_v57 }
 0x17e   :  { %1775 = vmatpush1.bf16.msra.mxu0 %v3152_v58 }
 0x17f   :  { %1776 = vmatprep.subr.bf16.mxu0 %v3157_v59 }
 0x182   :  { %1777 = vmatpush1.bf16.msra.mxu0 %v3155_v60 }
 0x183   :  { %1778 = vmatprep.subr.bf16.mxu0 %v3160_v61 }
 0x186   :  { %1779 = vmatpush1.bf16.msra.mxu0 %v3158_v62 }
 0x187   :  { %1780 = vmatprep.subr.bf16.mxu0 %v3163_v63 }
 0x18a   :  { %1781 = vmatpush1.bf16.msra.mxu0 %v3161_v0 }
 0x18b   :  { %1782 = vmatprep.subr.bf16.mxu0 %v3166_v1 }
 0x18e   :  { %1783 = vmatpush1.bf16.msra.mxu0 %v3164_v2 }
 0x18f   :  { %1784 = vmatprep.subr.bf16.mxu0 %v3169_v3 }
 0x192   :  { %1785 = vmatpush1.bf16.msra.mxu0 %v3167_v4 }
 0x193   :  { %1786 = vmatprep.subr.bf16.mxu0 %v3172_v5 }
 0x196   :  { %1787 = vmatpush1.bf16.msra.mxu0 %v3170_v6 }
 0x197   :  { %1788 = vmatprep.subr.bf16.mxu0 %v3175_v7 }
 0x19a   :  { %1789 = vmatpush1.bf16.msra.mxu0 %v3173_v8 }
 0x19b   :  { %1790 = vmatprep.subr.bf16.mxu0 %v3178_v9 }
 0x19e   :  { %1791 = vmatpush1.bf16.msra.mxu0 %v3176_v10 }
 0x19f   :  { %1792 = vmatprep.subr.bf16.mxu0 %v3181_v11 }
 0x1a2   :  { %1793 = vmatpush1.bf16.msra.mxu0 %v3179_v12 }
 0x1a3   :  { %1803 = vmatprep.subr.bf16.mxu0 %v3184_v13 }
 0x238   :  { %v1129_v34 = vpop.f32.mrb[4].mxu0  ;;  %v1211_v35 = vpop.f32.mrb[4].mxu1 }
 0x239   :  { %v3603_v36 = vadd.f32 %v1129_v34, %v397_v28  ;;  %v3605_v37 = vadd.f32 %v1211_v35, %v405_v30  ;;  %v1131_v38 = vpop.f32.mrb[5].mxu0  ;;  %v1213_v39 = vpop.f32.mrb[5].mxu1 }
 0x23a   :  { %v3607_v40 = vadd.f32 %v1131_v38, %v401_v32  ;;  %v3609_v14 = vadd.f32 %v1213_v39, %v409_v33  ;;  %v1133_v41 = vpop.f32.mrb[6].mxu0  ;;  %v1215_v42 = vpop.f32.mrb[6].mxu1 }
 0x23b   :  { %v1220_v43 = vrot.slane %v3603_v36, 4  ;;  %v1248_v44 = vmul.f32 %v3603_v36, %v3603_v36  ;;  %v1232_v45 = vrot.slane %v3605_v37, 4  ;;  %v1250_v16 = vmul.f32 %v3605_v37, %v3605_v37  ;;  %v1134_v46 = vpop.f32.mrb[7].mxu0  ;;  %v1216_v47 = vpop.f32.mrb[7].mxu1 }
 0x23c   :  { %v1226_v48 = vrot.slane %v3607_v40, 4  ;;  %v1249_v29 = vmul.f32 %v3607_v40, %v3607_v40  ;;  %v1238_v49 = vrot.slane %v3609_v14, 4  ;;  %v1251_v50 = vmul.f32 %v3609_v14, %v3609_v14 }
 0x23d   :  { %v1221_v51 = vadd.f32 %v3603_v36, %v1220_v43  ;;  %v1252_v52 = vrot.slane %v1248_v44, 4  ;;  %v1233_v53 = vadd.f32 %v3605_v37, %v1232_v45  ;;  %v1264_v54 = vrot.slane %v1250_v16, 4 }
 0x23e   :  { %v1227_v55 = vadd.f32 %v3607_v40, %v1226_v48  ;;  %v1258_v56 = vrot.slane %v1249_v29, 4  ;;  %v1239_v57 = vadd.f32 %v3609_v14, %v1238_v49  ;;  %v1270_v58 = vrot.slane %v1251_v50, 4 }
 0x23f   :  { %v1222_v59 = vrot.slane %v1221_v51, 2  ;;  %v1253_v60 = vadd.f32 %v1252_v52, %v1248_v44  ;;  %v1234_v61 = vrot.slane %v1233_v53, 2  ;;  %v1265_v62 = vadd.f32 %v1264_v54, %v1250_v16 }
 0x240   :  { %v1228_v63 = vrot.slane %v1227_v55, 2  ;;  %v1259_v0 = vadd.f32 %v1258_v56, %v1249_v29  ;;  %v1240_v1 = vrot.slane %v1239_v57, 2  ;;  %v1271_v2 = vadd.f32 %v1270_v58, %v1251_v50 }
 0x241   :  { %v1223_v3 = vadd.f32 %v1222_v59, %v1221_v51  ;;  %v1254_v4 = vrot.slane %v1253_v60, 2  ;;  %v1235_v5 = vadd.f32 %v1234_v61, %v1233_v53  ;;  %v1266_v6 = vrot.slane %v1265_v62, 2 }
 0x242   :  { %v1229_v7 = vadd.f32 %v1228_v63, %v1227_v55  ;;  %v1260_v8 = vrot.slane %v1259_v0, 2  ;;  %v1241_v9 = vadd.f32 %v1240_v1, %v1239_v57  ;;  %v1272_v10 = vrot.slane %v1271_v2, 2  ;;  %v1218_v63 = vld [vmem:[%s3865_s5] sm:$0xf] }
 0x243   :  { %v1224_v11 = vrot.slane %v1223_v3, 1  ;;  %v1255_v12 = vadd.f32 %v1254_v4, %v1253_v60  ;;  %v1236_v13 = vrot.slane %v1235_v5, 1  ;;  %v1267_v18 = vadd.f32 %v1266_v6, %v1265_v62 }
 0x244   :  { %v1230_v20 = vrot.slane %v1229_v7, 1  ;;  %v1261_v21 = vadd.f32 %v1260_v8, %v1259_v0  ;;  %v1242_v22 = vrot.slane %v1241_v9, 1  ;;  %v1273_v23 = vadd.f32 %v1272_v10, %v1271_v2  ;;  %v1219_v0 = vld [vmem:[%s3866_s6] sm:$0xf] }
 0x245   :  { %v1225_v24 = vadd.f32 %v1224_v11, %v1223_v3  ;;  %v1256_v25 = vrot.slane %v1255_v12, 1  ;;  %v1237_v26 = vadd.f32 %v1236_v13, %v1235_v5  ;;  %v1268_v27 = vrot.slane %v1267_v18, 1 }
 0x246   :  { %v1231_v28 = vadd.f32 %v1230_v20, %v1229_v7  ;;  %v1262_v30 = vrot.slane %v1261_v21, 1  ;;  %v1243_v32 = vadd.f32 %v1242_v22, %v1241_v9  ;;  %v1274_v33 = vrot.slane %v1273_v23, 1 }
 0x247   :  { %v1244_v34 = vmul.f32 0.125, %v1225_v24  ;;  %v1257_v35 = vadd.f32 %v1256_v25, %v1255_v12  ;;  %v1246_v38 = vmul.f32 0.125, %v1237_v26  ;;  %v1269_v39 = vadd.f32 %v1268_v27, %v1267_v18 }
 0x248   :  { %v1245_v41 = vmul.f32 0.125, %v1231_v28  ;;  %v1263_v42 = vadd.f32 %v1262_v30, %v1261_v21  ;;  %v1247_v43 = vmul.f32 0.125, %v1243_v32  ;;  %v1275_v44 = vadd.f32 %v1274_v33, %v1273_v23 }
 0x249   :  { %v1276_v45 = vmul.f32 0.125, %v1257_v35  ;;  %v1280_v16 = vmul.f32 %v1244_v34, %v1244_v34  ;;  %v1278_v46 = vmul.f32 0.125, %v1269_v39  ;;  %v1282_v47 = vmul.f32 %v1246_v38, %v1246_v38  ;;  %v3182_v35 = vld [vmem:[#allocation6 + $0x100] ss:$8 sps:$4 sm:$0xff]   ;;  %v3187_v39 = vld [vmem:[#allocation6 + $0x114] ss:$8 sps:$4 sm:$0xff]  }
 0x24a   :  { %v1277_v48 = vmul.f32 0.125, %v1263_v42  ;;  %v1281_v29 = vmul.f32 %v1245_v41, %v1245_v41  ;;  %v1279_v50 = vmul.f32 0.125, %v1275_v44  ;;  %v1283_v51 = vmul.f32 %v1247_v43, %v1247_v43  ;;  %v3190_v42 = vld [vmem:[#allocation6 + $0x124] ss:$8 sps:$4 sm:$0xff]   ;;  %v3193_v44 = vld [vmem:[#allocation6 + $0x134] ss:$8 sps:$4 sm:$0xff]  }
 0x24b   :  { %v1284_v49 = vsub.f32 %v1276_v45, %v1280_v16  ;;  %v1286_v52 = vsub.f32 %v1278_v46, %v1282_v47  ;;  %v1292_v1 = vsub.f32 %v3603_v36, %v1244_v34  ;;  %v1312_v2 = vrot.slane %v1218_v63, %v3545_v15  ;;  %v3191_v45 = vld [vmem:[#allocation6 + $0x130] ss:$8 sps:$4 sm:$0xff]   ;;  %v3196_v16 = vld [vmem:[#allocation6 + $0x144] ss:$8 sps:$4 sm:$0xff]   ;;  %v3194_v46 = vld [vmem:[#allocation6 + $0x140] ss:$8 sps:$4 sm:$0xff]  }
 0x24c   :  { %v1285_v53 = vsub.f32 %v1277_v48, %v1281_v29  ;;  %v1287_v55 = vsub.f32 %v1279_v50, %v1283_v51  ;;  %v1294_v4 = vsub.f32 %v3605_v37, %v1246_v38  ;;  %v1320_v5 = vrot.slane %v1218_v63, %v3567_v31  ;;  %v3199_v47 = vld [vmem:[#allocation6 + $0x154] ss:$8 sps:$4 sm:$0xff]   ;;  %v3197_v48 = vld [vmem:[#allocation6 + $0x150] ss:$8 sps:$4 sm:$0xff]   ;;  %v3202_v29 = vld [vmem:[#allocation6 + $0x164] ss:$8 sps:$4 sm:$0xff]  }
 0x24d   :  { %v1288_v54 = vmax.f32 %v1284_v49, 0.0  ;;  %v1290_v56 = vmax.f32 %v1286_v52, 0.0  ;;  %v1293_v8 = vsub.f32 %v3607_v40, %v1245_v41  ;;  %v1316_v9 = vrot.slane %v1218_v63, %v3553_v17  ;;  %v3200_v49 = vld [vmem:[#allocation6 + $0x160] ss:$8 sps:$4 sm:$0xff]   ;;  %v3205_v50 = vld [vmem:[#allocation6 + $0x174] ss:$8 sps:$4 sm:$0xff]  }
 0x24e   :  { %v1289_v57 = vmax.f32 %v1285_v53, 0.0  ;;  %v1291_v59 = vmax.f32 %v1287_v55, 0.0  ;;  %v1337_v10 = vrot.slane %v1219_v0, %v3545_v15  ;;  %v1295_v13 = vsub.f32 %v3609_v14, %v1247_v43  ;;  %v3188_v43 = vld [vmem:[#allocation6 + $0x120] ss:$8 sps:$4 sm:$0xff]   ;;  %v3203_v51 = vld [vmem:[#allocation6 + $0x170] ss:$8 sps:$4 sm:$0xff]  }
 0x24f   :  { %v1296_v58 = vadd.f32 1e-05, %v1288_v54  ;;  %v1298_v60 = vadd.f32 1e-05, %v1290_v56  ;;  %v1324_v36 = vrot.slane %v1218_v63, %v3558_v19  ;;  %v1345_v18 = vrot.slane %v1219_v0, %v3567_v31  ;;  %v3208_v52 = vld [vmem:[#allocation6 + $0x184] ss:$8 sps:$4 sm:$0xff]  }
 0x250   :  { %v1297_v61 = vadd.f32 1e-05, %v1289_v57  ;;  %v1299_v62 = vadd.f32 1e-05, %v1291_v59  ;;  %v1341_v21 = vrot.slane %v1219_v0, %v3553_v17  ;;  %v1349_v40 = vrot.slane %v1219_v0, %v3558_v19  ;;  %v3185_v19 = vld [vmem:[#allocation6 + $0x110] ss:$8 sps:$4 sm:$0xff]  }
 0x251   :  { %3310 = vrsqrt.f32 %v1296_v58  ;;  %v3206_v53 = vld [vmem:[#allocation6 + $0x180] ss:$8 sps:$4 sm:$0xff]   ;;  %v3211_v54 = vld [vmem:[#allocation6 + $0x194] ss:$8 sps:$4 sm:$0xff]   ;;  %v3209_v55 = vld [vmem:[#allocation6 + $0x190] ss:$8 sps:$4 sm:$0xff]  }
 0x252   :  { %3312 = vrsqrt.f32 %v1298_v60  ;;  %v3214_v56 = vld [vmem:[#allocation6 + $0x1a4] ss:$8 sps:$4 sm:$0xff]   ;;  %v3212_v57 = vld [vmem:[#allocation6 + $0x1a0] ss:$8 sps:$4 sm:$0xff]   ;;  %v3217_v58 = vld [vmem:[#allocation6 + $0x1b4] ss:$8 sps:$4 sm:$0xff]  }
 0x253   :  { %3314 = vrsqrt.f32 %v1297_v61  ;;  %v3215_v59 = vld [vmem:[#allocation6 + $0x1b0] ss:$8 sps:$4 sm:$0xff]   ;;  %v3220_v60 = vld [vmem:[#allocation6 + $0x1c4] ss:$8 sps:$4 sm:$0xff]   ;;  %v3218_v61 = vld [vmem:[#allocation6 + $0x1c0] ss:$8 sps:$4 sm:$0xff]  }
 0x254   :  { %3316 = vrsqrt.f32 %v1299_v62  ;;  %v3223_v62 = vld [vmem:[#allocation6 + $0x1d4] ss:$8 sps:$4 sm:$0xff]   ;;  %v3221_v63 = vld [vmem:[#allocation6 + $0x1d0] ss:$8 sps:$4 sm:$0xff]   ;;  %v3226_v0 = vld [vmem:[#allocation6 + $0x1e4] ss:$8 sps:$4 sm:$0xff]  }
 0x25b   :  { %v3311_v3 = vpop.eup %3310 }
 0x25c   :  { %v3313_v6 = vpop.eup %3312  ;;  %v1304_v7 = vmul.f32 %v3311_v3, %v1292_v1  ;;  %v3224_v1 = vld [vmem:[#allocation6 + $0x1e0] ss:$8 sps:$4 sm:$0xff]   ;;  %v3227_v3 = vld [vmem:[#allocation6 + $0x1f0] ss:$8 sps:$4 sm:$0xff]  }
 0x25d   :  { %v3315_v11 = vpop.eup %3314  ;;  %v1306_v12 = vmul.f32 %v3313_v6, %v1294_v4  ;;  %v3244_v6 = vld [vmem:[%s3871_s11 + $0x44] ss:$8 sps:$4 sm:$0xff]  }
 0x25e   :  { %v3317_v20 = vpop.eup %3316  ;;  %v1305_v37 = vmul.f32 %v3315_v11, %v1293_v8  ;;  %v1329_v22 = vmul.f32 %v1312_v2, %v1304_v7  ;;  %v3229_v2 = vld [vmem:[#allocation6 + $0x1f4] ss:$8 sps:$4 sm:$0xff]   ;;  %v3242_v7 = vld [vmem:[%s3871_s11 + $0x40] ss:$8 sps:$4 sm:$0xff]   ;;  %2132 = vmatprep.subr.bf16.mxu1 %v3244_v6 }
 0x25f   :  { %v1307_v23 = vmul.f32 %v3317_v20, %v1295_v13  ;;  %v1331_v24 = vmul.f32 %v1320_v5, %v1306_v12  ;;  %2133 = vmatpush1.bf16.msra.mxu1 %v3242_v7  ;;  %v3247_v8 = vld [vmem:[%s3871_s11 + $0x54] ss:$8 sps:$4 sm:$0xff]   ;;  %v3248_v11 = vld [vmem:[%s3871_s11 + $0x60] ss:$8 sps:$4 sm:$0xff]   ;;  %v3251_v13 = vld [vmem:[%s3871_s11 + $0x70] ss:$8 sps:$4 sm:$0xff]  }
 0x260   :  { %v1330_v25 = vmul.f32 %v1316_v9, %v1305_v37  ;;  %v1354_v26 = vadd.f32 %v1337_v10, %v1329_v22  ;;  %v3245_v9 = vld [vmem:[%s3871_s11 + $0x50] ss:$8 sps:$4 sm:$0xff]   ;;  %2134 = vmatprep.subr.bf16.mxu1 %v3247_v8  ;;  %v3250_v10 = vld [vmem:[%s3871_s11 + $0x64] ss:$8 sps:$4 sm:$0xff]   ;;  %v3253_v12 = vld [vmem:[%s3871_s11 + $0x74] ss:$8 sps:$4 sm:$0xff]  }
 0x261   :  { %v1332_v27 = vmul.f32 %v1324_v36, %v1307_v23  ;;  %v3645_v28 = vadd.f32 %v1345_v18, %v1331_v24  ;;  %v3256_v36 = vld [vmem:[%s3871_s11 + $0x84] ss:$8 sps:$4 sm:$0xff]   ;;  %v3254_v18 = vld [vmem:[%s3871_s11 + $0x80] ss:$8 sps:$4 sm:$0xff]   ;;  %v3259_v20 = vld [vmem:[%s3871_s11 + $0x94] ss:$8 sps:$4 sm:$0xff]  }
 0x262   :  { %v1355_v30 = vadd.f32 %v1341_v21, %v1330_v25  ;;  %v1358_v14 = vmax.f32 %v1354_v26, 0.0  ;;  %v3257_v37 = vld [vmem:[%s3871_s11 + $0x90] ss:$8 sps:$4 sm:$0xff]   ;;  %v3262_v21 = vld [vmem:[%s3871_s11 + $0xa4] ss:$8 sps:$4 sm:$0xff]  }
 0x263   :  { %v1357_v32 = vadd.f32 %v1349_v40, %v1332_v27  ;;  %v1360_v4 = vmax.f32 %v3645_v28, 0.0  ;;  %2135 = vmatpush1.bf16.msra.mxu1 %v3245_v9  ;;  %v3260_v22 = vld [vmem:[%s3871_s11 + $0xa0] ss:$8 sps:$4 sm:$0xff]   ;;  %v3265_v23 = vld [vmem:[%s3871_s11 + $0xb4] ss:$8 sps:$4 sm:$0xff]  }
 0x264   :  { %v1359_v33 = vmax.f32 %v1355_v30, 0.0  ;;  %v1427_v38 = vpack.c.bf16 %v1358_v14, %v1358_v14  ;;  %2136 = vmatprep.subr.bf16.mxu1 %v3250_v10  ;;  %v3263_v40 = vld [vmem:[%s3871_s11 + $0xb0] ss:$8 sps:$4 sm:$0xff]   ;;  %v3268_v24 = vld [vmem:[%s3871_s11 + $0xc4] ss:$8 sps:$4 sm:$0xff]  }
 0x265   :  { %v1361_v34 = vmax.f32 %v1357_v32, 0.0  ;;  %v1429_v5 = vpack.c.bf16 %v1360_v4, %v1360_v4  ;;  %v3266_v25 = vld [vmem:[%s3871_s11 + $0xc0] ss:$8 sps:$4 sm:$0xff]   ;;  %v3271_v26 = vld [vmem:[%s3871_s11 + $0xd4] ss:$8 sps:$4 sm:$0xff]  }
 0x266   :  { %v1428_v31 = vpack.c.bf16 %v1359_v33, %v1359_v33  ;;  %v3269_v27 = vld [vmem:[%s3871_s11 + $0xd0] ss:$8 sps:$4 sm:$0xff]   ;;  %v3274_v28 = vld [vmem:[%s3871_s11 + $0xe4] ss:$8 sps:$4 sm:$0xff]   ;;  %v3272_v30 = vld [vmem:[%s3871_s11 + $0xe0] ss:$8 sps:$4 sm:$0xff]  }
 0x267   :  { %v1430_v41 = vpack.c.bf16 %v1361_v34, %v1361_v34  ;;  %2137 = vmatpush1.bf16.msra.mxu1 %v3248_v11  ;;  %v3277_v14 = vld [vmem:[%s3871_s11 + $0xf4] ss:$8 sps:$4 sm:$0xff]   ;;  %v3275_v32 = vld [vmem:[%s3871_s11 + $0xf0] ss:$8 sps:$4 sm:$0xff]   ;;  %v1426_v33 = vld [vmem:[%s3868_s8] sm:$0x3] }
 0x268   :  { %1794 = vmatprep.mubr.bf16.mxu0 %v1428_v31  ;;  %2138 = vmatprep.subr.bf16.mxu1 %v3253_v12  ;;  %v1435_v34 = vrot.slane %v1426_v33, %v3545_v15  ;;  %v1439_v31 = vrot.slane %v1426_v33, %v3553_v17 }
 0x269   :  { %1795 = vmatmul.mubr.bf16.vlgmr.msra.gmra.mrb[8].mxu0 %v1427_v38 }
 0x26a   :  { %1804 = vmatpush1.bf16.msra.mxu0 %v3182_v35  ;;  %1835 = vmatprep.mubr.bf16.mxu0 %v1430_v41 }
 0x26b   :  { %1805 = vmatprep.subr.bf16.mxu0 %v3187_v39  ;;  %2139 = vmatpush1.bf16.msra.mxu1 %v3251_v13 }
 0x26c   :  { %2140 = vmatprep.subr.bf16.mxu1 %v3256_v36 }
 0x26e   :  { %1806 = vmatpush1.bf16.msra.mxu0 %v3185_v19 }
 0x26f   :  { %1807 = vmatprep.subr.bf16.mxu0 %v3190_v42  ;;  %2141 = vmatpush1.bf16.msra.mxu1 %v3254_v18  ;;  %v1844_v18 = vld [vmem:[%s3869_s9] sm:$0x3] }
 0x270   :  { %2142 = vmatprep.subr.bf16.mxu1 %v3259_v20  ;;  %v1845_v20 = vld [vmem:[%s3870_s10] sm:$0x3] }
 0x272   :  { %1808 = vmatpush1.bf16.msra.mxu0 %v3188_v43 }
 0x273   :  { %1809 = vmatprep.subr.bf16.mxu0 %v3193_v44  ;;  %2143 = vmatpush1.bf16.msra.mxu1 %v3257_v37 }
 0x274   :  { %2144 = vmatprep.subr.bf16.mxu1 %v3262_v21  ;;  %v1894_v21 = vrot.slane %v1844_v18, %v3545_v15 }
 0x276   :  { %1810 = vmatpush1.bf16.msra.mxu0 %v3191_v45 }
 0x277   :  { %1811 = vmatprep.subr.bf16.mxu0 %v3196_v16  ;;  %2145 = vmatpush1.bf16.msra.mxu1 %v3260_v22 }
 0x278   :  { %2146 = vmatprep.subr.bf16.mxu1 %v3265_v23 }
 0x27a   :  { %1812 = vmatpush1.bf16.msra.mxu0 %v3194_v46 }
 0x27b   :  { %1813 = vmatprep.subr.bf16.mxu0 %v3199_v47  ;;  %2147 = vmatpush1.bf16.msra.mxu1 %v3263_v40  ;;  %v1898_v40 = vrot.slane %v1844_v18, %v3553_v17 }
 0x27c   :  { %2148 = vmatprep.subr.bf16.mxu1 %v3268_v24 }
 0x27e   :  { %1814 = vmatpush1.bf16.msra.mxu0 %v3197_v48 }
 0x27f   :  { %1815 = vmatprep.subr.bf16.mxu0 %v3202_v29  ;;  %2149 = vmatpush1.bf16.msra.mxu1 %v3266_v25 }
 0x280   :  { %2150 = vmatprep.subr.bf16.mxu1 %v3271_v26  ;;  %v1907_v26 = vrot.slane %v1845_v20, %v3545_v15 }
 0x282   :  { %1816 = vmatpush1.bf16.msra.mxu0 %v3200_v49 }
 0x283   :  { %1817 = vmatprep.subr.bf16.mxu0 %v3205_v50  ;;  %2151 = vmatpush1.bf16.msra.mxu1 %v3269_v27 }
 0x284   :  { %2152 = vmatprep.subr.bf16.mxu1 %v3274_v28  ;;  %v1911_v28 = vrot.slane %v1845_v20, %v3553_v17 }
 0x286   :  { %1818 = vmatpush1.bf16.msra.mxu0 %v3203_v51 }
 0x287   :  { %1819 = vmatprep.subr.bf16.mxu0 %v3208_v52  ;;  %2153 = vmatpush1.bf16.msra.mxu1 %v3272_v30 }
 0x288   :  { %2154 = vmatprep.subr.bf16.mxu1 %v3277_v14 }
 0x28a   :  { %1820 = vmatpush1.bf16.msra.mxu0 %v3206_v53 }
 0x28b   :  { %1821 = vmatprep.subr.bf16.mxu0 %v3211_v54  ;;  %2155 = vmatpush1.bf16.msra.mxu1 %v3275_v32 }
 0x28e   :  { %1822 = vmatpush1.bf16.msra.mxu0 %v3209_v55 }
 0x28f   :  { %1823 = vmatprep.subr.bf16.mxu0 %v3214_v56 }
 0x292   :  { %1824 = vmatpush1.bf16.msra.mxu0 %v3212_v57 }
 0x293   :  { %1825 = vmatprep.subr.bf16.mxu0 %v3217_v58 }
 0x296   :  { %1826 = vmatpush1.bf16.msra.mxu0 %v3215_v59 }
 0x297   :  { %1827 = vmatprep.subr.bf16.mxu0 %v3220_v60 }
 0x29a   :  { %1828 = vmatpush1.bf16.msra.mxu0 %v3218_v61 }
 0x29b   :  { %1829 = vmatprep.subr.bf16.mxu0 %v3223_v62 }
 0x29e   :  { %1830 = vmatpush1.bf16.msra.mxu0 %v3221_v63 }
 0x29f   :  { %1831 = vmatprep.subr.bf16.mxu0 %v3226_v0 }
 0x2a2   :  { %1832 = vmatpush1.bf16.msra.mxu0 %v3224_v1 }
 0x2a3   :  { %1833 = vmatprep.subr.bf16.mxu0 %v3229_v2 }
 0x2a6   :  { %1834 = vmatpush1.bf16.msra.mxu0 %v3227_v3 }
 0x2a9   :  { %1836 = vmatmul.mubr.bf16.vlgmr.msra.gmra.mrb[8].mxu0 %v1429_v5 }
 0x37c   :  { %v1837_v35 = vpop.f32.mrb[8].mxu0 }
 0x37d   :  { %v2908_v38 = vadd.f32 %v1837_v35, %v1435_v34  ;;  %v1839_v39 = vpop.f32.mrb[9].mxu0 }
 0x37e   :  { %v2909_v41 = vadd.f32 %v1839_v39, %v1439_v31  ;;  %v1841_v19 = vpop.f32.mrb[10].mxu0  ;;  %v3278_v39 = vld [vmem:[%s3875_s15 + $0x40] sm:$0xff]  }
 0x37f   :  { %v1846_v42 = vrot.slane %v2908_v38, 4  ;;  %v1860_v43 = vmul.f32 %v2908_v38, %v2908_v38  ;;  %v1842_v44 = vpop.f32.mrb[11].mxu0  ;;  %2860 = vmatprep.subr.bf16.mxu1 %v3278_v39  ;;  %v3280_v19 = vld [vmem:[%s3875_s15 + $0x48] sm:$0xff]  }
 0x380   :  { %v1852_v45 = vrot.slane %v2909_v41, 4  ;;  %v1861_v16 = vmul.f32 %v2909_v41, %v2909_v41  ;;  %v3283_v44 = vld [vmem:[%s3875_s15 + $0x10] sm:$0xff]  }
 0x381   :  { %v1847_v46 = vadd.f32 %v2908_v38, %v1846_v42  ;;  %v1862_v47 = vrot.slane %v1860_v43, 4  ;;  %v3281_v42 = vld [vmem:[%s3875_s15 + $0x8] sm:$0xff]  }
 0x382   :  { %v1853_v48 = vadd.f32 %v2909_v41, %v1852_v45  ;;  %v1868_v29 = vrot.slane %v1861_v16, 4  ;;  %v3284_v45 = vld [vmem:[%s3875_s15 + $0x58] sm:$0xff]  }
 0x383   :  { %v1848_v49 = vrot.slane %v1847_v46, 2  ;;  %v1863_v50 = vadd.f32 %v1862_v47, %v1860_v43  ;;  %v3282_v43 = vld [vmem:[%s3875_s15 + $0x50] sm:$0xff]   ;;  %v3287_v47 = vld [vmem:[%s3875_s15 + $0x20] sm:$0xff]  }
 0x384   :  { %v1854_v51 = vrot.slane %v1853_v48, 2  ;;  %v1869_v52 = vadd.f32 %v1868_v29, %v1861_v16  ;;  %v3285_v16 = vld [vmem:[%s3875_s15 + $0x18] sm:$0xff]   ;;  %v3289_v29 = vld [vmem:[%s3875_s15 + $0x28] sm:$0xff]  }
 0x385   :  { %v1849_v53 = vadd.f32 %v1848_v49, %v1847_v46  ;;  %v1864_v54 = vrot.slane %v1863_v50, 2  ;;  %v3286_v46 = vld [vmem:[%s3875_s15 + $0x60] sm:$0xff]   ;;  %v3290_v49 = vld [vmem:[%s3875_s15 + $0x70] sm:$0xff]  }
 0x386   :  { %v1855_v55 = vadd.f32 %v1854_v51, %v1853_v48  ;;  %v1870_v56 = vrot.slane %v1869_v52, 2  ;;  %v3288_v48 = vld [vmem:[%s3875_s15 + $0x68] sm:$0xff]   ;;  %v3292_v51 = vld [vmem:[%s3875_s15 + $0x78] sm:$0xff]  }
 0x387   :  { %v1850_v57 = vrot.slane %v1849_v53, 1  ;;  %v1865_v58 = vadd.f32 %v1864_v54, %v1863_v50  ;;  %v3291_v50 = vld [vmem:[%s3875_s15 + $0x30] sm:$0xff]   ;;  %v1950_v54 = vld [vmem:[%s3872_s12] sm:$0x3] }
 0x388   :  { %v1856_v59 = vrot.slane %v1855_v55, 1  ;;  %v1871_v60 = vadd.f32 %v1870_v56, %v1869_v52  ;;  %v3293_v52 = vld [vmem:[%s3875_s15 + $0x38] sm:$0xff]   ;;  %v1961_v56 = vrot.slane %v1950_v54, %v3553_v17 }
 0x389   :  { %v1851_v61 = vadd.f32 %v1850_v57, %v1849_v53  ;;  %v1866_v62 = vrot.slane %v1865_v58, 1  ;;  %v3294_v53 = vld [vmem:[%s3875_s15 + $0xc0] sm:$0xff]  }
 0x38a   :  { %v1857_v63 = vadd.f32 %v1856_v59, %v1855_v55  ;;  %v1872_v0 = vrot.slane %v1871_v60, 1  ;;  %v1957_v55 = vrot.slane %v1950_v54, %v3545_v15 }
 0x38b   :  { %v1858_v1 = vmul.f32 0.125, %v1851_v61  ;;  %v1867_v2 = vadd.f32 %v1866_v62, %v1865_v58 }
 0x38c   :  { %v1859_v3 = vmul.f32 0.125, %v1857_v63  ;;  %v1873_v4 = vadd.f32 %v1872_v0, %v1871_v60 }
 0x38d   :  { %v1874_v5 = vmul.f32 0.125, %v1867_v2  ;;  %v1876_v6 = vmul.f32 %v1858_v1, %v1858_v1  ;;  %v1882_v37 = vsub.f32 %v2908_v38, %v1858_v1 }
 0x38e   :  { %v1875_v7 = vmul.f32 0.125, %v1873_v4  ;;  %v1877_v8 = vmul.f32 %v1859_v3, %v1859_v3  ;;  %v1883_v23 = vsub.f32 %v2909_v41, %v1859_v3  ;;  %v3279_v41 = vld [vmem:[%s3875_s15] sm:$0xff]  }
 0x38f   :  { %v1878_v9 = vsub.f32 %v1874_v5, %v1876_v6 }
 0x390   :  { %v1879_v10 = vsub.f32 %v1875_v7, %v1877_v8 }
 0x391   :  { %v1880_v11 = vmax.f32 %v1878_v9, 0.0 }
 0x392   :  { %v1881_v12 = vmax.f32 %v1879_v10, 0.0 }
 0x393   :  { %v1884_v13 = vadd.f32 1e-05, %v1880_v11 }
 0x394   :  { %v1885_v36 = vadd.f32 1e-05, %v1881_v12 }
 0x395   :  { %3318 = vrsqrt.f32 %v1884_v13 }
 0x396   :  { %3320 = vrsqrt.f32 %v1885_v36 }
 0x39f   :  { %v3319_v22 = vpop.eup %3318 }
 0x3a0   :  { %v3321_v24 = vpop.eup %3320  ;;  %v1888_v25 = vmul.f32 %v3319_v22, %v1882_v37 }
 0x3a1   :  { %v1889_v27 = vmul.f32 %v3321_v24, %v1883_v23 }
 0x3a2   :  { %v1901_v30 = vmul.f32 %v1894_v21, %v1888_v25 }
 0x3a3   :  { %v1902_v14 = vmul.f32 %v1898_v40, %v1889_v27 }
 0x3a4   :  { %v1914_v32 = vadd.f32 %v1907_v26, %v1901_v30 }
 0x3a5   :  { %v1915_v33 = vadd.f32 %v1911_v28, %v1902_v14 }
 0x3a6   :  { %v1916_v34 = vmax.f32 %v1914_v32, 0.0 }
 0x3a7   :  { %v1917_v31 = vmax.f32 %v1915_v33, 0.0 }
 0x3a8   :  { %v3737_v38 = vpack.c.bf16 %v1916_v34, %v1916_v34 }
 0x3a9   :  { %v3735_v35 = vpack.c.bf16 %v1917_v31, %v1917_v31 }
 0x3ab   :  { %2156 = vmatprep.mubr.bf16.mxu1 %v3735_v35 }
 0x3ac   :  { %2157 = vmatmul.mubr.bf16.vlgmr.msra.gmra.mrb[8].mxu1 %v3737_v38 }
 0x3ad   :  { %2861 = vmatpush3.bf16.msra.mxu1 %v3279_v41 }
 0x3ae   :  { %2862 = vmatprep.subr.bf16.mxu1 %v3280_v19 }
 0x3b1   :  { %2863 = vmatpush3.bf16.msra.mxu1 %v3281_v42 }
 0x3b2   :  { %2864 = vmatprep.subr.bf16.mxu1 %v3282_v43  ;;  %v2165_v43 = vld [vmem:[%s3873_s13] sm:$0x3] }
 0x3b5   :  { %2865 = vmatpush3.bf16.msra.mxu1 %v3283_v44  ;;  %v2166_v44 = vld [vmem:[%s3874_s14] sm:$0x3] }
 0x3b6   :  { %2866 = vmatprep.subr.bf16.mxu1 %v3284_v45 }
 0x3b9   :  { %2867 = vmatpush3.bf16.msra.mxu1 %v3285_v16  ;;  %v2215_v16 = vrot.slane %v2165_v43, %v3545_v15 }
 0x3ba   :  { %2868 = vmatprep.subr.bf16.mxu1 %v3286_v46 }
 0x3bd   :  { %2869 = vmatpush3.bf16.msra.mxu1 %v3287_v47 }
 0x3be   :  { %2870 = vmatprep.subr.bf16.mxu1 %v3288_v48  ;;  %v2219_v48 = vrot.slane %v2165_v43, %v3553_v17 }
 0x3c1   :  { %2871 = vmatpush3.bf16.msra.mxu1 %v3289_v29 }
 0x3c2   :  { %2872 = vmatprep.subr.bf16.mxu1 %v3290_v49 }
 0x3c5   :  { %2873 = vmatpush3.bf16.msra.mxu1 %v3291_v50  ;;  %v2228_v50 = vrot.slane %v2166_v44, %v3545_v15  ;;  %v3297_v15 = vld [vmem:[%s3875_s15 + $0x88] sm:$0xff]  }
 0x3c6   :  { %2874 = vmatprep.subr.bf16.mxu1 %v3292_v51 }
 0x3c9   :  { %2875 = vmatpush3.bf16.msra.mxu1 %v3293_v52  ;;  %v2232_v52 = vrot.slane %v2166_v44, %v3553_v17  ;;  %v3298_v17 = vld [vmem:[%s3875_s15 + $0xd0] sm:$0xff]  }
 0x3ca   :  { %2882 = vmatprep.subr.bf16.mxu1 %v3294_v53 }
 0x47f   :  { %v2158_v57 = vpop.f32.mrb[8].mxu1 }
 0x480   :  { %v2159_v58 = vadd.f32 %v2158_v57, %v1957_v55  ;;  %v2160_v59 = vpop.f32.mrb[9].mxu1 }
 0x481   :  { %v2161_v60 = vadd.f32 %v2160_v59, %v1961_v56  ;;  %v2162_v61 = vpop.f32.mrb[10].mxu1 }
 0x482   :  { %v2167_v62 = vrot.slane %v2159_v58, 4  ;;  %v2181_v63 = vmul.f32 %v2159_v58, %v2159_v58  ;;  %v2163_v0 = vpop.f32.mrb[11].mxu1 }
 0x483   :  { %v2173_v1 = vrot.slane %v2161_v60, 4  ;;  %v2182_v2 = vmul.f32 %v2161_v60, %v2161_v60  ;;  %v3300_v0 = vld [vmem:[%s3875_s15 + $0xd8] sm:$0xff]  }
 0x484   :  { %v2168_v3 = vadd.f32 %v2167_v62, %v2159_v58  ;;  %v2183_v4 = vrot.slane %v2181_v63, 4  ;;  %v3296_v62 = vld [vmem:[%s3875_s15 + $0xc8] sm:$0xff]  }
 0x485   :  { %v2174_v5 = vadd.f32 %v2173_v1, %v2161_v60  ;;  %v2189_v6 = vrot.slane %v2182_v2, 4  ;;  %v3302_v1 = vld [vmem:[%s3875_s15 + $0xe0] sm:$0xff]  }
 0x486   :  { %v2169_v7 = vrot.slane %v2168_v3, 2  ;;  %v2184_v8 = vadd.f32 %v2183_v4, %v2181_v63  ;;  %v3299_v63 = vld [vmem:[%s3875_s15 + $0x90] sm:$0xff]   ;;  %v3305_v4 = vld [vmem:[%s3875_s15 + $0xa8] sm:$0xff]  }
 0x487   :  { %v2175_v9 = vrot.slane %v2174_v5, 2  ;;  %v2190_v10 = vadd.f32 %v2189_v6, %v2182_v2  ;;  %v3303_v2 = vld [vmem:[%s3875_s15 + $0xa0] sm:$0xff]   ;;  %v3307_v6 = vld [vmem:[%s3875_s15 + $0xb0] sm:$0xff]  }
 0x488   :  { %v2170_v11 = vadd.f32 %v2169_v7, %v2168_v3  ;;  %v2185_v12 = vrot.slane %v2184_v8, 2  ;;  %v3304_v3 = vld [vmem:[%s3875_s15 + $0xe8] sm:$0xff]   ;;  %v3308_v7 = vld [vmem:[%s3875_s15 + $0xf8] sm:$0xff]  }
 0x489   :  { %v2176_v13 = vadd.f32 %v2175_v9, %v2174_v5  ;;  %v2191_v36 = vrot.slane %v2190_v10, 2  ;;  %v3306_v5 = vld [vmem:[%s3875_s15 + $0xf0] sm:$0xff]  }
 0x48a   :  { %v2171_v18 = vrot.slane %v2170_v11, 1  ;;  %v2186_v20 = vadd.f32 %v2185_v12, %v2184_v8  ;;  %v3309_v8 = vld [vmem:[%s3875_s15 + $0xb8] sm:$0xff]  }
 0x48b   :  { %v2177_v37 = vrot.slane %v2176_v13, 1  ;;  %v2192_v21 = vadd.f32 %v2191_v36, %v2190_v10  ;;  %v2827_v36 = vld [vmem:[%s3876_s16] ss:$0 sm:$0xff] }
 0x48c   :  { %v2172_v22 = vadd.f32 %v2171_v18, %v2170_v11  ;;  %v2187_v23 = vrot.slane %v2186_v20, 1 }
 0x48d   :  { %v2178_v40 = vadd.f32 %v2177_v37, %v2176_v13  ;;  %v2193_v24 = vrot.slane %v2192_v21, 1 }
 0x48e   :  { %v2179_v25 = vmul.f32 0.125, %v2172_v22  ;;  %v2188_v26 = vadd.f32 %v2187_v23, %v2186_v20 }
 0x48f   :  { %v2180_v27 = vmul.f32 0.125, %v2178_v40  ;;  %v2194_v28 = vadd.f32 %v2193_v24, %v2192_v21 }
 0x490   :  { %v2195_v30 = vmul.f32 0.125, %v2188_v26  ;;  %v2197_v14 = vmul.f32 %v2179_v25, %v2179_v25  ;;  %v2203_v45 = vsub.f32 %v2159_v58, %v2179_v25 }
 0x491   :  { %v2196_v32 = vmul.f32 0.125, %v2194_v28  ;;  %v2198_v33 = vmul.f32 %v2180_v27, %v2180_v27  ;;  %v2204_v47 = vsub.f32 %v2161_v60, %v2180_v27  ;;  %v3295_v60 = vld [vmem:[%s3875_s15 + $0x80] sm:$0xff]  }
 0x492   :  { %v2199_v34 = vsub.f32 %v2195_v30, %v2197_v14 }
 0x493   :  { %v2200_v31 = vsub.f32 %v2196_v32, %v2198_v33 }
 0x494   :  { %v2201_v39 = vmax.f32 %v2199_v34, 0.0 }
 0x495   :  { %v2202_v41 = vmax.f32 %v2200_v31, 0.0 }
 0x496   :  { %v2205_v19 = vadd.f32 1e-05, %v2201_v39 }
 0x497   :  { %v2206_v42 = vadd.f32 1e-05, %v2202_v41 }
 0x498   :  { %3322 = vrsqrt.f32 %v2205_v19 }
 0x499   :  { %3324 = vrsqrt.f32 %v2206_v42 }
 0x4a2   :  { %v3323_v46 = vpop.eup %3322 }
 0x4a3   :  { %v3325_v29 = vpop.eup %3324  ;;  %v2209_v49 = vmul.f32 %v3323_v46, %v2203_v45 }
 0x4a4   :  { %v2210_v51 = vmul.f32 %v3325_v29, %v2204_v47 }
 0x4a5   :  { %v2222_v53 = vmul.f32 %v2215_v16, %v2209_v49 }
 0x4a6   :  { %v2223_v54 = vmul.f32 %v2219_v48, %v2210_v51 }
 0x4a7   :  { %v2235_v55 = vadd.f32 %v2228_v50, %v2222_v53 }
 0x4a8   :  { %v2236_v56 = vadd.f32 %v2232_v52, %v2223_v54 }
 0x4a9   :  { %v2237_v57 = vmax.f32 %v2235_v55, 0.0 }
 0x4aa   :  { %v2238_v59 = vmax.f32 %v2236_v56, 0.0 }
 0x4ab   :  { %v2304_v61 = vpack.c.bf16 %v2237_v57, %v2237_v57 }
 0x4ac   :  { %v2305_v58 = vpack.c.bf16 %v2238_v59, %v2238_v59 }
 0x4ae   :  { %2536 = vmatprep.mubr.bf16.mxu1 %v2305_v58 }
 0x4af   :  { %2537 = vmatmul.mubr.bf16.vlgmr.msra.gmra.mrb[12].mxu1 %v2304_v61 }
 0x4b0   :  { %2883 = vmatpush3.bf16.msra.mxu1 %v3295_v60  ;;  %2576 = vmatprep.mubr.bf16.mxu1 %v3735_v35  ;;  %v3301_v35 = vld [vmem:[%s3875_s15 + $0x98] sm:$0xff]  }
 0x4b1   :  { %2884 = vmatprep.subr.bf16.mxu1 %v3296_v62 }
 0x4b4   :  { %2885 = vmatpush3.bf16.msra.mxu1 %v3297_v15 }
 0x4b5   :  { %2886 = vmatprep.subr.bf16.mxu1 %v3298_v17 }
 0x4b8   :  { %2887 = vmatpush3.bf16.msra.mxu1 %v3299_v63 }
 0x4b9   :  { %2888 = vmatprep.subr.bf16.mxu1 %v3300_v0 }
 0x4bc   :  { %2889 = vmatpush3.bf16.msra.mxu1 %v3301_v35 }
 0x4bd   :  { %2890 = vmatprep.subr.bf16.mxu1 %v3302_v1 }
 0x4c0   :  { %2891 = vmatpush3.bf16.msra.mxu1 %v3303_v2 }
 0x4c1   :  { %2892 = vmatprep.subr.bf16.mxu1 %v3304_v3 }
 0x4c4   :  { %2893 = vmatpush3.bf16.msra.mxu1 %v3305_v4 }
 0x4c5   :  { %2894 = vmatprep.subr.bf16.mxu1 %v3306_v5 }
 0x4c8   :  { %2895 = vmatpush3.bf16.msra.mxu1 %v3307_v6 }
 0x4c9   :  { %2896 = vmatprep.subr.bf16.mxu1 %v3308_v7 }
 0x4cc   :  { %2897 = vmatpush3.bf16.msra.mxu1 %v3309_v8 }
 0x4cf   :  { %2577 = vmatmul.mubr.bf16.vlgmr.msra.gmra.mrb[16].mxu1 %v3737_v38 }
 0x582   :  { %v2876_v9 = vpop.f32.mrb[12].mxu1 }
 0x583   :  { %v2877_v10 = vpop.f32.mrb[13].mxu1 }
 0x584   :  { %v2878_v11 = vadd.f32 %v2877_v10, %v2876_v9  ;;  %v2879_v12 = vpop.f32.mrb[14].mxu1 }
 0x585   :  { %v2880_v13 = vpop.f32.mrb[15].mxu1 }
 0x586   :  { %v2539_v37 = vadd.f32 %v2878_v11, %v2827_v36 }
 0x5a2   :  { %v2898_v18 = vpop.f32.mrb[16].mxu1 }
 0x5a3   :  { %v2899_v20 = vpop.f32.mrb[17].mxu1 }
 0x5a4   :  { %v2900_v21 = vadd.f32 %v2899_v20, %v2898_v18  ;;  %v2901_v22 = vpop.f32.mrb[18].mxu1 }
 0x5a5   :  { %v2902_v23 = vpop.f32.mrb[19].mxu1 }
 0x5a6   :  { %v2579_v40 = vadd.f32 %v2900_v21, %v2539_v37 }
 0x5a8   :  { %3326 = vtanh.f32 %v2579_v40 }
 0x5b2   :  { %v3327_v24 = vpop.eup %3326 }
 0x5b3   :  { %2586 = vst.msk [vmem:[%s3877_s17] sm:$0xff] %vm2585_vm1, %v3327_v24 }
 0x5b4   :  { %2591 = vsyncpa [#allocation3], 1 }
 0x5b5   :  { %2592 = vsyncpa [#allocation5], 1 }

</bundles_post_ra>
